<compile_context>
chip_gen: v7x
topology: tpu7x:2x2x1
jax: 0.10.0
libtpu: 0.0.40
codegen_flags: <defaults>
</compile_context>

<pallas_src>
import functools

import jax
import jax.numpy as jnp
from jax import lax
from jax.experimental import pallas as pl
from jax.experimental.pallas import tpu as pltpu


def _round_up(x, m):
    return ((x + m - 1) // m) * m


# --------------------------- kernel 1: GRU recurrence --------------------------
def _gru_kernel(emb_ref, wih_ref, whh_ref, bcat_ref, bhhn_ref, hs_ref, h_scr, *, H):
    """One grid step == T time steps of the GRU recurrence (statically unrolled)."""
    c = pl.program_id(0)
    T = emb_ref.shape[0]

    # zero initial hidden state at the first chunk
    @pl.when(c == 0)
    def _():
        h_scr[...] = jnp.zeros_like(h_scr)

    # hoist resident operands out of the unrolled loop (one VMEM load each)
    wih = wih_ref[...]            # (E, 3H)
    whh = whh_ref[...]            # (H, 3H)
    bcat = bcat_ref[...]          # (1, 3H)   folded (b_ir+b_hr, b_iz+b_hz, b_in)
    bhhn = bhhn_ref[...]          # (1, H)    b_hn

    h = h_scr[...]                # (Bp, H) carried hidden state
    for t in range(T):            # fully unrolled, t static
        x = emb_ref[t]            # (Bp, E)

        # fused gate pre-activations: one (Bp,E)x(E,3H) and one (Bp,H)x(H,3H) matmul
        gi = jnp.dot(x, wih, preferred_element_type=jnp.float32) + bcat
        gh = jnp.dot(h, whh, preferred_element_type=jnp.float32)

        gi_r, gi_z, gi_n = gi[:, :H], gi[:, H:2 * H], gi[:, 2 * H:]
        gh_r, gh_z = gh[:, :H], gh[:, H:2 * H]
        gh_n = gh[:, 2 * H:] + bhhn

        # PyTorch GRU cell semantics
        r = jax.nn.sigmoid(gi_r + gh_r)
        z = jax.nn.sigmoid(gi_z + gh_z)
        n = jnp.tanh(gi_n + r * gh_n)
        h = (1.0 - z) * n + z * h

        hs_ref[t] = h

    h_scr[...] = h                # carry into next time chunk


# ------------------- kernel 2: output projection + log_softmax ------------------
def _proj_logsoftmax_kernel(x_ref, w_ref, b_ref, out_ref):
    logits = jnp.dot(x_ref[...], w_ref[...],
                     preferred_element_type=jnp.float32) + b_ref[...]     # (tm, V)
    m = jnp.max(logits, axis=-1, keepdims=True)
    lse = m + jnp.log(jnp.sum(jnp.exp(logits - m), axis=-1, keepdims=True))
    out_ref[...] = logits - lse


# ----------------------------------- wrapper ------------------------------------
def lm_forward(inp, params, *, t_chunk=8):
    """Forward pass of LM. inp: (S, B) int32. Returns (outs, hidden, weights)."""
    emb_table = params["emb_table"]                     # (V, E)
    wih, whh = params["w_ih"], params["w_hh"]           # (3,E,H), (3,H,H)
    bih, bhh = params["b_ih"], params["b_hh"]           # (3,1,H), (3,1,H)
    wproj, bproj = params["w_proj"], params["b_proj"]   # (H,V), (1,V)

    S, B = inp.shape
    V, E = emb_table.shape
    H = wih.shape[-1]

    # --- param prep: fuse gate weights, pre-fold r/z biases ---
    wih_cat = jnp.concatenate([wih[0], wih[1], wih[2]], axis=-1)              # (E, 3H)
    whh_cat = jnp.concatenate([whh[0], whh[1], whh[2]], axis=-1)              # (H, 3H)
    b_cat = jnp.concatenate([bih[0] + bhh[0], bih[1] + bhh[1], bih[2]], -1)   # (1, 3H)
    b_hh_n = bhh[2]                                                           # (1, H)

    # --- glue: embedding gather, pad batch to 8 sublanes, pad time to chunk ---
    emb = jnp.take(emb_table, inp, axis=0).astype(jnp.float32)                # (S, B, E)
    Bp = _round_up(B, 8)
    T = t_chunk if S >= t_chunk else S
    T = max(T, 1)
    S_pad = _round_up(S, T)
    emb = jnp.pad(emb, ((0, S_pad - S), (0, Bp - B), (0, 0)))                 # (S_pad, Bp, E)

    # ----------------- pallas_call 1: GRU over time (sequential) -----------------
    gru_grid = pltpu.PrefetchScalarGridSpec(
        num_scalar_prefetch=0,
        grid=(S_pad // T,),
        in_specs=[
            pl.BlockSpec((T, Bp, E), lambda c: (c, 0, 0)),    # emb, streamed by time chunk
            pl.BlockSpec((E, 3 * H), lambda c: (0, 0)),       # W_ih fused (resident)
            pl.BlockSpec((H, 3 * H), lambda c: (0, 0)),       # W_hh fused (resident)
            pl.BlockSpec((1, 3 * H), lambda c: (0, 0)),       # folded bias (r,z,n_ih)
            pl.BlockSpec((1, H), lambda c: (0, 0)),           # b_hh_n
        ],
        out_specs=pl.BlockSpec((T, Bp, H), lambda c: (c, 0, 0)),
        scratch_shapes=[pltpu.VMEM((Bp, H), jnp.float32)],    # carried hidden state
    )

    hs3d = pl.pallas_call(
        functools.partial(_gru_kernel, H=H),
        out_shape=jax.ShapeDtypeStruct((S_pad, Bp, H), jnp.float32),
        grid_spec=gru_grid,
        compiler_params=pltpu.CompilerParams(
            dimension_semantics=("arbitrary",)),              # recurrent over time
    )(emb, wih_cat, whh_cat, b_cat, b_hh_n)

    # final hidden = hidden at real last time step, real batch rows
    hidden = hs3d[S - 1, :B, :].reshape(1, B, H)

    # -------- pallas_call 2: output projection + log_softmax (parallel) ---------
    x = hs3d[:S, :B, :].reshape(S * B, H)
    rows = S * B
    tm = 128 if rows >= 128 else _round_up(rows, 8)
    rows_pad = _round_up(rows, tm)
    x = jnp.pad(x, ((0, rows_pad - rows), (0, 0)))

    proj_grid = pltpu.PrefetchScalarGridSpec(
        num_scalar_prefetch=0,
        grid=(rows_pad // tm,),
        in_specs=[
            pl.BlockSpec((tm, H), lambda i: (i, 0)),          # hidden-state rows
            pl.BlockSpec((H, V), lambda i: (0, 0)),           # W_proj (resident)
            pl.BlockSpec((1, V), lambda i: (0, 0)),           # b_proj
        ],
        out_specs=pl.BlockSpec((tm, V), lambda i: (i, 0)),
    )

    outs_pad = pl.pallas_call(
        _proj_logsoftmax_kernel,
        out_shape=jax.ShapeDtypeStruct((rows_pad, V), jnp.float32),
        grid_spec=proj_grid,
        compiler_params=pltpu.CompilerParams(
            dimension_semantics=("parallel",)),               # shardable across TCs
    )(x, wproj, bproj)

    outs = outs_pad[:rows]              # (S*B, V)
    return outs, hidden, None           # weights is None (no attention)


# ----------------------------- pure-JAX reference ----------------------------
def lm_forward_ref(inp, params):
    emb_table = params["emb_table"]
    wih, whh = params["w_ih"], params["w_hh"]
    bih, bhh = params["b_ih"], params["b_hh"]
    wproj, bproj = params["w_proj"], params["b_proj"]
    S, B = inp.shape
    H = wih.shape[-1]
    emb = jnp.take(emb_table, inp, axis=0)
    hp = lax.Precision.HIGHEST

    def step(h, x):
        gi = [jnp.dot(x, wih[k], precision=hp) + bih[k] for k in range(3)]
        gh = [jnp.dot(h, whh[k], precision=hp) + bhh[k] for k in range(3)]
        r = jax.nn.sigmoid(gi[0] + gh[0])
        z = jax.nn.sigmoid(gi[1] + gh[1])
        n = jnp.tanh(gi[2] + r * gh[2])
        h_new = (1.0 - z) * n + z * h
        return h_new, h_new

    h_last, hs = lax.scan(step, jnp.zeros((B, H), jnp.float32), emb)
    logits = jnp.dot(hs.reshape(S * B, H), wproj, precision=hp) + bproj
    outs = jax.nn.log_softmax(logits, axis=-1)
    return outs, h_last.reshape(1, B, H), None


# ----------------------------------- main ------------------------------------
if __name__ == "__main__":
    vocab, emb_dim, hid_dim = 128, 32, 32
    seq_len, batch = 8, 4

    key = jax.random.PRNGKey(0)
    ks = jax.random.split(key, 8)
    stdv = 1.0 / jnp.sqrt(hid_dim)

    params = {
        "emb_table": jax.random.normal(ks[0], (vocab, emb_dim), jnp.float32) * 0.1,
        "w_ih": jax.random.uniform(ks[1], (3, emb_dim, hid_dim), jnp.float32, -stdv, stdv),
        "w_hh": jax.random.uniform(ks[2], (3, hid_dim, hid_dim), jnp.float32, -stdv, stdv),
        "b_ih": jax.random.uniform(ks[3], (3, 1, hid_dim), jnp.float32, -stdv, stdv),
        "b_hh": jax.random.uniform(ks[4], (3, 1, hid_dim), jnp.float32, -stdv, stdv),
        "w_proj": jax.random.uniform(ks[5], (hid_dim, vocab), jnp.float32, -stdv, stdv),
        "b_proj": jax.random.uniform(ks[6], (1, vocab), jnp.float32, -stdv, stdv),
    }

    inp = jax.random.randint(ks[7], (seq_len, batch), 0, vocab, dtype=jnp.int32)

    fwd = jax.jit(lm_forward)
    outs, hidden, weights = jax.block_until_ready(fwd(inp, params))
    outs_ref, hidden_ref, _ = jax.block_until_ready(lm_forward_ref(inp, params))

    assert outs.shape == (seq_len * batch, vocab)
    assert hidden.shape == (1, batch, hid_dim)
    assert weights is None
    assert jnp.allclose(outs, outs_ref, atol=5e-4, rtol=5e-4)
    assert jnp.allclose(hidden, hidden_ref, atol=5e-4, rtol=5e-4)

    print("KERNEL_OK")
</pallas_src>

<mosaic_0001>
module attributes {stable_mosaic.version = 11 : i64} {
  func.func @_gru_kernel(%arg0: i32, %arg1: memref<8x8x32xf32, #tpu.memory_space<vmem>>, %arg2: memref<32x96xf32, #tpu.memory_space<vmem>>, %arg3: memref<32x96xf32, #tpu.memory_space<vmem>>, %arg4: memref<1x96xf32, #tpu.memory_space<vmem>>, %arg5: memref<1x32xf32, #tpu.memory_space<vmem>>, %arg6: memref<8x8x32xf32, #tpu.memory_space<vmem>>, %arg7: memref<8x32xf32, #tpu.memory_space<vmem>>) attributes {dimension_semantics = [#tpu.dimension_semantics<arbitrary>], iteration_bounds = array<i64: 1>, scalar_prefetch = 0 : i64, scratch_operands = 1 : i64, tpu.core_type = #tpu.core_type<tc>, window_params = [{transform_indices = @transform_0, window_bounds = array<i64: 8, 8, 32>}, {pipeline_mode = #tpu.pipeline_mode<synchronous>, transform_indices = @transform_1, window_bounds = array<i64: 32, 96>}, {pipeline_mode = #tpu.pipeline_mode<synchronous>, transform_indices = @transform_2, window_bounds = array<i64: 32, 96>}, {pipeline_mode = #tpu.pipeline_mode<synchronous>, transform_indices = @transform_3, window_bounds = array<i64: 1, 96>}, {pipeline_mode = #tpu.pipeline_mode<synchronous>, transform_indices = @transform_4, window_bounds = array<i64: 1, 32>}, {transform_indices = @transform_5, window_bounds = array<i64: 8, 8, 32>}]} {
    %c0_i32 = arith.constant 0 : i32
    %0 = arith.cmpi eq, %arg0, %c0_i32 : i32
    %1 = arith.extui %0 : i1 to i32
    %c0_i32_0 = arith.constant 0 : i32
    %2 = arith.cmpi ne, %1, %c0_i32_0 : i32
    scf.if %2 {
      %cst_92 = arith.constant 0.000000e+00 : f32
      %305 = vector.broadcast %cst_92 : f32 to vector<8x32xf32>
      %c0_93 = arith.constant 0 : index
      %c0_94 = arith.constant 0 : index
      %306 = vector.load %arg7[%c0_93, %c0_94] : memref<8x32xf32, #tpu.memory_space<vmem>>, vector<8x32xf32>
      tpu.vector_store %arg7[%c0_93, %c0_94], %305 {strides = array<i32>} : memref<8x32xf32, #tpu.memory_space<vmem>>, vector<8x32xf32>,
    } else {
    }
    %c0 = arith.constant 0 : index
    %c0_1 = arith.constant 0 : index
    %3 = vector.load %arg2[%c0, %c0_1] : memref<32x96xf32, #tpu.memory_space<vmem>>, vector<32x96xf32>
    %c0_2 = arith.constant 0 : index
    %c0_3 = arith.constant 0 : index
    %4 = vector.load %arg3[%c0_2, %c0_3] : memref<32x96xf32, #tpu.memory_space<vmem>>, vector<32x96xf32>
    %c0_4 = arith.constant 0 : index
    %c0_5 = arith.constant 0 : index
    %5 = vector.load %arg4[%c0_4, %c0_5] : memref<1x96xf32, #tpu.memory_space<vmem>>, vector<1x96xf32>
    %c0_6 = arith.constant 0 : index
    %c0_7 = arith.constant 0 : index
    %6 = vector.load %arg5[%c0_6, %c0_7] : memref<1x32xf32, #tpu.memory_space<vmem>>, vector<1x32xf32>
    %c0_8 = arith.constant 0 : index
    %c0_9 = arith.constant 0 : index
    %7 = vector.load %arg7[%c0_8, %c0_9] : memref<8x32xf32, #tpu.memory_space<vmem>>, vector<8x32xf32>
    %c0_10 = arith.constant 0 : index
    %c0_11 = arith.constant 0 : index
    %c0_12 = arith.constant 0 : index
    %8 = vector.load %arg1[%c0_10, %c0_11, %c0_12] : memref<8x8x32xf32, #tpu.memory_space<vmem>>, vector<1x8x32xf32>
    %9 = vector.shape_cast %8 : vector<1x8x32xf32> to vector<8x32xf32>
    %cst = arith.constant dense<0.000000e+00> : vector<8x96xf32>
    %10 = tpu.matmul %9, %3, %cst {dimension_numbers = #tpu.dot_dimension_numbers<[1], [0], [0], [1], [0, 0, 1, 1], [], []>} : vector<8x32xf32>, vector<32x96xf32>, vector<8x96xf32> -> vector<8x96xf32>
    %11 = vector.broadcast %5 : vector<1x96xf32> to vector<8x96xf32>
    %12 = arith.addf %10, %11 : vector<8x96xf32>
    %cst_13 = arith.constant dense<0.000000e+00> : vector<8x96xf32>
    %13 = tpu.matmul %7, %4, %cst_13 {dimension_numbers = #tpu.dot_dimension_numbers<[1], [0], [0], [1], [0, 0, 1, 1], [], []>} : vector<8x32xf32>, vector<32x96xf32>, vector<8x96xf32> -> vector<8x96xf32>
    %14 = vector.extract_strided_slice %12 {offsets = [0, 0], sizes = [8, 32], strides = [1, 1]} : vector<8x96xf32> to vector<8x32xf32>
    %15 = vector.extract_strided_slice %12 {offsets = [0, 32], sizes = [8, 32], strides = [1, 1]} : vector<8x96xf32> to vector<8x32xf32>
    %16 = vector.extract_strided_slice %12 {offsets = [0, 64], sizes = [8, 32], strides = [1, 1]} : vector<8x96xf32> to vector<8x32xf32>
    %17 = vector.extract_strided_slice %13 {offsets = [0, 0], sizes = [8, 32], strides = [1, 1]} : vector<8x96xf32> to vector<8x32xf32>
    %18 = vector.extract_strided_slice %13 {offsets = [0, 32], sizes = [8, 32], strides = [1, 1]} : vector<8x96xf32> to vector<8x32xf32>
    %19 = vector.extract_strided_slice %13 {offsets = [0, 64], sizes = [8, 32], strides = [1, 1]} : vector<8x96xf32> to vector<8x32xf32>
    %20 = vector.broadcast %6 : vector<1x32xf32> to vector<8x32xf32>
    %21 = arith.addf %19, %20 : vector<8x32xf32>
    %22 = arith.addf %14, %17 : vector<8x32xf32>
    %23 = arith.negf %22 : vector<8x32xf32>
    %24 = math.exp %23 : vector<8x32xf32>
    %cst_14 = arith.constant 1.000000e+00 : f32
    %25 = vector.broadcast %cst_14 : f32 to vector<8x32xf32>
    %26 = arith.addf %25, %24 : vector<8x32xf32>
    %27 = arith.divf %25, %26 : vector<8x32xf32>
    %28 = arith.addf %15, %18 : vector<8x32xf32>
    %29 = arith.negf %28 : vector<8x32xf32>
    %30 = math.exp %29 : vector<8x32xf32>
    %cst_15 = arith.constant 1.000000e+00 : f32
    %31 = vector.broadcast %cst_15 : f32 to vector<8x32xf32>
    %32 = arith.addf %31, %30 : vector<8x32xf32>
    %33 = arith.divf %31, %32 : vector<8x32xf32>
    %34 = arith.mulf %27, %21 : vector<8x32xf32>
    %35 = arith.addf %16, %34 : vector<8x32xf32>
    %36 = math.tanh %35 : vector<8x32xf32>
    %cst_16 = arith.constant 1.000000e+00 : f32
    %37 = vector.broadcast %cst_16 : f32 to vector<8x32xf32>
    %38 = arith.subf %37, %33 : vector<8x32xf32>
    %39 = arith.mulf %38, %36 : vector<8x32xf32>
    %40 = arith.mulf %33, %7 : vector<8x32xf32>
    %41 = arith.addf %39, %40 : vector<8x32xf32>
    %c0_17 = arith.constant 0 : index
    %c0_18 = arith.constant 0 : index
    %c0_19 = arith.constant 0 : index
    %42 = vector.load %arg6[%c0_17, %c0_18, %c0_19] : memref<8x8x32xf32, #tpu.memory_space<vmem>>, vector<1x8x32xf32>
    %43 = vector.shape_cast %42 : vector<1x8x32xf32> to vector<8x32xf32>
    %44 = vector.shape_cast %41 : vector<8x32xf32> to vector<1x8x32xf32>
    tpu.vector_store %arg6[%c0_17, %c0_18, %c0_19], %44 {strides = array<i32>} : memref<8x8x32xf32, #tpu.memory_space<vmem>>, vector<1x8x32xf32>,
    %c1 = arith.constant 1 : index
    %c0_20 = arith.constant 0 : index
    %c0_21 = arith.constant 0 : index
    %45 = vector.load %arg1[%c1, %c0_20, %c0_21] : memref<8x8x32xf32, #tpu.memory_space<vmem>>, vector<1x8x32xf32>
    %46 = vector.shape_cast %45 : vector<1x8x32xf32> to vector<8x32xf32>
    %cst_22 = arith.constant dense<0.000000e+00> : vector<8x96xf32>
    %47 = tpu.matmul %46, %3, %cst_22 {dimension_numbers = #tpu.dot_dimension_numbers<[1], [0], [0], [1], [0, 0, 1, 1], [], []>} : vector<8x32xf32>, vector<32x96xf32>, vector<8x96xf32> -> vector<8x96xf32>
    %48 = vector.broadcast %5 : vector<1x96xf32> to vector<8x96xf32>
    %49 = arith.addf %47, %48 : vector<8x96xf32>
    %cst_23 = arith.constant dense<0.000000e+00> : vector<8x96xf32>
    %50 = tpu.matmul %41, %4, %cst_23 {dimension_numbers = #tpu.dot_dimension_numbers<[1], [0], [0], [1], [0, 0, 1, 1], [], []>} : vector<8x32xf32>, vector<32x96xf32>, vector<8x96xf32> -> vector<8x96xf32>
    %51 = vector.extract_strided_slice %49 {offsets = [0, 0], sizes = [8, 32], strides = [1, 1]} : vector<8x96xf32> to vector<8x32xf32>
    %52 = vector.extract_strided_slice %49 {offsets = [0, 32], sizes = [8, 32], strides = [1, 1]} : vector<8x96xf32> to vector<8x32xf32>
    %53 = vector.extract_strided_slice %49 {offsets = [0, 64], sizes = [8, 32], strides = [1, 1]} : vector<8x96xf32> to vector<8x32xf32>
    %54 = vector.extract_strided_slice %50 {offsets = [0, 0], sizes = [8, 32], strides = [1, 1]} : vector<8x96xf32> to vector<8x32xf32>
    %55 = vector.extract_strided_slice %50 {offsets = [0, 32], sizes = [8, 32], strides = [1, 1]} : vector<8x96xf32> to vector<8x32xf32>
    %56 = vector.extract_strided_slice %50 {offsets = [0, 64], sizes = [8, 32], strides = [1, 1]} : vector<8x96xf32> to vector<8x32xf32>
    %57 = vector.broadcast %6 : vector<1x32xf32> to vector<8x32xf32>
    %58 = arith.addf %56, %57 : vector<8x32xf32>
    %59 = arith.addf %51, %54 : vector<8x32xf32>
    %60 = arith.negf %59 : vector<8x32xf32>
    %61 = math.exp %60 : vector<8x32xf32>
    %cst_24 = arith.constant 1.000000e+00 : f32
    %62 = vector.broadcast %cst_24 : f32 to vector<8x32xf32>
    %63 = arith.addf %62, %61 : vector<8x32xf32>
    %64 = arith.divf %62, %63 : vector<8x32xf32>
    %65 = arith.addf %52, %55 : vector<8x32xf32>
    %66 = arith.negf %65 : vector<8x32xf32>
    %67 = math.exp %66 : vector<8x32xf32>
    %cst_25 = arith.constant 1.000000e+00 : f32
    %68 = vector.broadcast %cst_25 : f32 to vector<8x32xf32>
    %69 = arith.addf %68, %67 : vector<8x32xf32>
    %70 = arith.divf %68, %69 : vector<8x32xf32>
    %71 = arith.mulf %64, %58 : vector<8x32xf32>
    %72 = arith.addf %53, %71 : vector<8x32xf32>
    %73 = math.tanh %72 : vector<8x32xf32>
    %cst_26 = arith.constant 1.000000e+00 : f32
    %74 = vector.broadcast %cst_26 : f32 to vector<8x32xf32>
    %75 = arith.subf %74, %70 : vector<8x32xf32>
    %76 = arith.mulf %75, %73 : vector<8x32xf32>
    %77 = arith.mulf %70, %41 : vector<8x32xf32>
    %78 = arith.addf %76, %77 : vector<8x32xf32>
    %c1_27 = arith.constant 1 : index
    %c0_28 = arith.constant 0 : index
    %c0_29 = arith.constant 0 : index
    %79 = vector.load %arg6[%c1_27, %c0_28, %c0_29] : memref<8x8x32xf32, #tpu.memory_space<vmem>>, vector<1x8x32xf32>
    %80 = vector.shape_cast %79 : vector<1x8x32xf32> to vector<8x32xf32>
    %81 = vector.shape_cast %78 : vector<8x32xf32> to vector<1x8x32xf32>
    tpu.vector_store %arg6[%c1_27, %c0_28, %c0_29], %81 {strides = array<i32>} : memref<8x8x32xf32, #tpu.memory_space<vmem>>, vector<1x8x32xf32>,
    %c2 = arith.constant 2 : index
    %c0_30 = arith.constant 0 : index
    %c0_31 = arith.constant 0 : index
    %82 = vector.load %arg1[%c2, %c0_30, %c0_31] : memref<8x8x32xf32, #tpu.memory_space<vmem>>, vector<1x8x32xf32>
    %83 = vector.shape_cast %82 : vector<1x8x32xf32> to vector<8x32xf32>
    %cst_32 = arith.constant dense<0.000000e+00> : vector<8x96xf32>
    %84 = tpu.matmul %83, %3, %cst_32 {dimension_numbers = #tpu.dot_dimension_numbers<[1], [0], [0], [1], [0, 0, 1, 1], [], []>} : vector<8x32xf32>, vector<32x96xf32>, vector<8x96xf32> -> vector<8x96xf32>
    %85 = vector.broadcast %5 : vector<1x96xf32> to vector<8x96xf32>
    %86 = arith.addf %84, %85 : vector<8x96xf32>
    %cst_33 = arith.constant dense<0.000000e+00> : vector<8x96xf32>
    %87 = tpu.matmul %78, %4, %cst_33 {dimension_numbers = #tpu.dot_dimension_numbers<[1], [0], [0], [1], [0, 0, 1, 1], [], []>} : vector<8x32xf32>, vector<32x96xf32>, vector<8x96xf32> -> vector<8x96xf32>
    %88 = vector.extract_strided_slice %86 {offsets = [0, 0], sizes = [8, 32], strides = [1, 1]} : vector<8x96xf32> to vector<8x32xf32>
    %89 = vector.extract_strided_slice %86 {offsets = [0, 32], sizes = [8, 32], strides = [1, 1]} : vector<8x96xf32> to vector<8x32xf32>
    %90 = vector.extract_strided_slice %86 {offsets = [0, 64], sizes = [8, 32], strides = [1, 1]} : vector<8x96xf32> to vector<8x32xf32>
    %91 = vector.extract_strided_slice %87 {offsets = [0, 0], sizes = [8, 32], strides = [1, 1]} : vector<8x96xf32> to vector<8x32xf32>
    %92 = vector.extract_strided_slice %87 {offsets = [0, 32], sizes = [8, 32], strides = [1, 1]} : vector<8x96xf32> to vector<8x32xf32>
    %93 = vector.extract_strided_slice %87 {offsets = [0, 64], sizes = [8, 32], strides = [1, 1]} : vector<8x96xf32> to vector<8x32xf32>
    %94 = vector.broadcast %6 : vector<1x32xf32> to vector<8x32xf32>
    %95 = arith.addf %93, %94 : vector<8x32xf32>
    %96 = arith.addf %88, %91 : vector<8x32xf32>
    %97 = arith.negf %96 : vector<8x32xf32>
    %98 = math.exp %97 : vector<8x32xf32>
    %cst_34 = arith.constant 1.000000e+00 : f32
    %99 = vector.broadcast %cst_34 : f32 to vector<8x32xf32>
    %100 = arith.addf %99, %98 : vector<8x32xf32>
    %101 = arith.divf %99, %100 : vector<8x32xf32>
    %102 = arith.addf %89, %92 : vector<8x32xf32>
    %103 = arith.negf %102 : vector<8x32xf32>
    %104 = math.exp %103 : vector<8x32xf32>
    %cst_35 = arith.constant 1.000000e+00 : f32
    %105 = vector.broadcast %cst_35 : f32 to vector<8x32xf32>
    %106 = arith.addf %105, %104 : vector<8x32xf32>
    %107 = arith.divf %105, %106 : vector<8x32xf32>
    %108 = arith.mulf %101, %95 : vector<8x32xf32>
    %109 = arith.addf %90, %108 : vector<8x32xf32>
    %110 = math.tanh %109 : vector<8x32xf32>
    %cst_36 = arith.constant 1.000000e+00 : f32
    %111 = vector.broadcast %cst_36 : f32 to vector<8x32xf32>
    %112 = arith.subf %111, %107 : vector<8x32xf32>
    %113 = arith.mulf %112, %110 : vector<8x32xf32>
    %114 = arith.mulf %107, %78 : vector<8x32xf32>
    %115 = arith.addf %113, %114 : vector<8x32xf32>
    %c2_37 = arith.constant 2 : index
    %c0_38 = arith.constant 0 : index
    %c0_39 = arith.constant 0 : index
    %116 = vector.load %arg6[%c2_37, %c0_38, %c0_39] : memref<8x8x32xf32, #tpu.memory_space<vmem>>, vector<1x8x32xf32>
    %117 = vector.shape_cast %116 : vector<1x8x32xf32> to vector<8x32xf32>
    %118 = vector.shape_cast %115 : vector<8x32xf32> to vector<1x8x32xf32>
    tpu.vector_store %arg6[%c2_37, %c0_38, %c0_39], %118 {strides = array<i32>} : memref<8x8x32xf32, #tpu.memory_space<vmem>>, vector<1x8x32xf32>,
    %c3 = arith.constant 3 : index
    %c0_40 = arith.constant 0 : index
    %c0_41 = arith.constant 0 : index
    %119 = vector.load %arg1[%c3, %c0_40, %c0_41] : memref<8x8x32xf32, #tpu.memory_space<vmem>>, vector<1x8x32xf32>
    %120 = vector.shape_cast %119 : vector<1x8x32xf32> to vector<8x32xf32>
    %cst_42 = arith.constant dense<0.000000e+00> : vector<8x96xf32>
    %121 = tpu.matmul %120, %3, %cst_42 {dimension_numbers = #tpu.dot_dimension_numbers<[1], [0], [0], [1], [0, 0, 1, 1], [], []>} : vector<8x32xf32>, vector<32x96xf32>, vector<8x96xf32> -> vector<8x96xf32>
    %122 = vector.broadcast %5 : vector<1x96xf32> to vector<8x96xf32>
    %123 = arith.addf %121, %122 : vector<8x96xf32>
    %cst_43 = arith.constant dense<0.000000e+00> : vector<8x96xf32>
    %124 = tpu.matmul %115, %4, %cst_43 {dimension_numbers = #tpu.dot_dimension_numbers<[1], [0], [0], [1], [0, 0, 1, 1], [], []>} : vector<8x32xf32>, vector<32x96xf32>, vector<8x96xf32> -> vector<8x96xf32>
    %125 = vector.extract_strided_slice %123 {offsets = [0, 0], sizes = [8, 32], strides = [1, 1]} : vector<8x96xf32> to vector<8x32xf32>
    %126 = vector.extract_strided_slice %123 {offsets = [0, 32], sizes = [8, 32], strides = [1, 1]} : vector<8x96xf32> to vector<8x32xf32>
    %127 = vector.extract_strided_slice %123 {offsets = [0, 64], sizes = [8, 32], strides = [1, 1]} : vector<8x96xf32> to vector<8x32xf32>
    %128 = vector.extract_strided_slice %124 {offsets = [0, 0], sizes = [8, 32], strides = [1, 1]} : vector<8x96xf32> to vector<8x32xf32>
    %129 = vector.extract_strided_slice %124 {offsets = [0, 32], sizes = [8, 32], strides = [1, 1]} : vector<8x96xf32> to vector<8x32xf32>
    %130 = vector.extract_strided_slice %124 {offsets = [0, 64], sizes = [8, 32], strides = [1, 1]} : vector<8x96xf32> to vector<8x32xf32>
    %131 = vector.broadcast %6 : vector<1x32xf32> to vector<8x32xf32>
    %132 = arith.addf %130, %131 : vector<8x32xf32>
    %133 = arith.addf %125, %128 : vector<8x32xf32>
    %134 = arith.negf %133 : vector<8x32xf32>
    %135 = math.exp %134 : vector<8x32xf32>
    %cst_44 = arith.constant 1.000000e+00 : f32
    %136 = vector.broadcast %cst_44 : f32 to vector<8x32xf32>
    %137 = arith.addf %136, %135 : vector<8x32xf32>
    %138 = arith.divf %136, %137 : vector<8x32xf32>
    %139 = arith.addf %126, %129 : vector<8x32xf32>
    %140 = arith.negf %139 : vector<8x32xf32>
    %141 = math.exp %140 : vector<8x32xf32>
    %cst_45 = arith.constant 1.000000e+00 : f32
    %142 = vector.broadcast %cst_45 : f32 to vector<8x32xf32>
    %143 = arith.addf %142, %141 : vector<8x32xf32>
    %144 = arith.divf %142, %143 : vector<8x32xf32>
    %145 = arith.mulf %138, %132 : vector<8x32xf32>
    %146 = arith.addf %127, %145 : vector<8x32xf32>
    %147 = math.tanh %146 : vector<8x32xf32>
    %cst_46 = arith.constant 1.000000e+00 : f32
    %148 = vector.broadcast %cst_46 : f32 to vector<8x32xf32>
    %149 = arith.subf %148, %144 : vector<8x32xf32>
    %150 = arith.mulf %149, %147 : vector<8x32xf32>
    %151 = arith.mulf %144, %115 : vector<8x32xf32>
    %152 = arith.addf %150, %151 : vector<8x32xf32>
    %c3_47 = arith.constant 3 : index
    %c0_48 = arith.constant 0 : index
    %c0_49 = arith.constant 0 : index
    %153 = vector.load %arg6[%c3_47, %c0_48, %c0_49] : memref<8x8x32xf32, #tpu.memory_space<vmem>>, vector<1x8x32xf32>
    %154 = vector.shape_cast %153 : vector<1x8x32xf32> to vector<8x32xf32>
    %155 = vector.shape_cast %152 : vector<8x32xf32> to vector<1x8x32xf32>
    tpu.vector_store %arg6[%c3_47, %c0_48, %c0_49], %155 {strides = array<i32>} : memref<8x8x32xf32, #tpu.memory_space<vmem>>, vector<1x8x32xf32>,
    %c4 = arith.constant 4 : index
    %c0_50 = arith.constant 0 : index
    %c0_51 = arith.constant 0 : index
    %156 = vector.load %arg1[%c4, %c0_50, %c0_51] : memref<8x8x32xf32, #tpu.memory_space<vmem>>, vector<1x8x32xf32>
    %157 = vector.shape_cast %156 : vector<1x8x32xf32> to vector<8x32xf32>
    %cst_52 = arith.constant dense<0.000000e+00> : vector<8x96xf32>
    %158 = tpu.matmul %157, %3, %cst_52 {dimension_numbers = #tpu.dot_dimension_numbers<[1], [0], [0], [1], [0, 0, 1, 1], [], []>} : vector<8x32xf32>, vector<32x96xf32>, vector<8x96xf32> -> vector<8x96xf32>
    %159 = vector.broadcast %5 : vector<1x96xf32> to vector<8x96xf32>
    %160 = arith.addf %158, %159 : vector<8x96xf32>
    %cst_53 = arith.constant dense<0.000000e+00> : vector<8x96xf32>
    %161 = tpu.matmul %152, %4, %cst_53 {dimension_numbers = #tpu.dot_dimension_numbers<[1], [0], [0], [1], [0, 0, 1, 1], [], []>} : vector<8x32xf32>, vector<32x96xf32>, vector<8x96xf32> -> vector<8x96xf32>
    %162 = vector.extract_strided_slice %160 {offsets = [0, 0], sizes = [8, 32], strides = [1, 1]} : vector<8x96xf32> to vector<8x32xf32>
    %163 = vector.extract_strided_slice %160 {offsets = [0, 32], sizes = [8, 32], strides = [1, 1]} : vector<8x96xf32> to vector<8x32xf32>
    %164 = vector.extract_strided_slice %160 {offsets = [0, 64], sizes = [8, 32], strides = [1, 1]} : vector<8x96xf32> to vector<8x32xf32>
    %165 = vector.extract_strided_slice %161 {offsets = [0, 0], sizes = [8, 32], strides = [1, 1]} : vector<8x96xf32> to vector<8x32xf32>
    %166 = vector.extract_strided_slice %161 {offsets = [0, 32], sizes = [8, 32], strides = [1, 1]} : vector<8x96xf32> to vector<8x32xf32>
    %167 = vector.extract_strided_slice %161 {offsets = [0, 64], sizes = [8, 32], strides = [1, 1]} : vector<8x96xf32> to vector<8x32xf32>
    %168 = vector.broadcast %6 : vector<1x32xf32> to vector<8x32xf32>
    %169 = arith.addf %167, %168 : vector<8x32xf32>
    %170 = arith.addf %162, %165 : vector<8x32xf32>
    %171 = arith.negf %170 : vector<8x32xf32>
    %172 = math.exp %171 : vector<8x32xf32>
    %cst_54 = arith.constant 1.000000e+00 : f32
    %173 = vector.broadcast %cst_54 : f32 to vector<8x32xf32>
    %174 = arith.addf %173, %172 : vector<8x32xf32>
    %175 = arith.divf %173, %174 : vector<8x32xf32>
    %176 = arith.addf %163, %166 : vector<8x32xf32>
    %177 = arith.negf %176 : vector<8x32xf32>
    %178 = math.exp %177 : vector<8x32xf32>
    %cst_55 = arith.constant 1.000000e+00 : f32
    %179 = vector.broadcast %cst_55 : f32 to vector<8x32xf32>
    %180 = arith.addf %179, %178 : vector<8x32xf32>
    %181 = arith.divf %179, %180 : vector<8x32xf32>
    %182 = arith.mulf %175, %169 : vector<8x32xf32>
    %183 = arith.addf %164, %182 : vector<8x32xf32>
    %184 = math.tanh %183 : vector<8x32xf32>
    %cst_56 = arith.constant 1.000000e+00 : f32
    %185 = vector.broadcast %cst_56 : f32 to vector<8x32xf32>
    %186 = arith.subf %185, %181 : vector<8x32xf32>
    %187 = arith.mulf %186, %184 : vector<8x32xf32>
    %188 = arith.mulf %181, %152 : vector<8x32xf32>
    %189 = arith.addf %187, %188 : vector<8x32xf32>
    %c4_57 = arith.constant 4 : index
    %c0_58 = arith.constant 0 : index
    %c0_59 = arith.constant 0 : index
    %190 = vector.load %arg6[%c4_57, %c0_58, %c0_59] : memref<8x8x32xf32, #tpu.memory_space<vmem>>, vector<1x8x32xf32>
    %191 = vector.shape_cast %190 : vector<1x8x32xf32> to vector<8x32xf32>
    %192 = vector.shape_cast %189 : vector<8x32xf32> to vector<1x8x32xf32>
    tpu.vector_store %arg6[%c4_57, %c0_58, %c0_59], %192 {strides = array<i32>} : memref<8x8x32xf32, #tpu.memory_space<vmem>>, vector<1x8x32xf32>,
    %c5 = arith.constant 5 : index
    %c0_60 = arith.constant 0 : index
    %c0_61 = arith.constant 0 : index
    %193 = vector.load %arg1[%c5, %c0_60, %c0_61] : memref<8x8x32xf32, #tpu.memory_space<vmem>>, vector<1x8x32xf32>
    %194 = vector.shape_cast %193 : vector<1x8x32xf32> to vector<8x32xf32>
    %cst_62 = arith.constant dense<0.000000e+00> : vector<8x96xf32>
    %195 = tpu.matmul %194, %3, %cst_62 {dimension_numbers = #tpu.dot_dimension_numbers<[1], [0], [0], [1], [0, 0, 1, 1], [], []>} : vector<8x32xf32>, vector<32x96xf32>, vector<8x96xf32> -> vector<8x96xf32>
    %196 = vector.broadcast %5 : vector<1x96xf32> to vector<8x96xf32>
    %197 = arith.addf %195, %196 : vector<8x96xf32>
    %cst_63 = arith.constant dense<0.000000e+00> : vector<8x96xf32>
    %198 = tpu.matmul %189, %4, %cst_63 {dimension_numbers = #tpu.dot_dimension_numbers<[1], [0], [0], [1], [0, 0, 1, 1], [], []>} : vector<8x32xf32>, vector<32x96xf32>, vector<8x96xf32> -> vector<8x96xf32>
    %199 = vector.extract_strided_slice %197 {offsets = [0, 0], sizes = [8, 32], strides = [1, 1]} : vector<8x96xf32> to vector<8x32xf32>
    %200 = vector.extract_strided_slice %197 {offsets = [0, 32], sizes = [8, 32], strides = [1, 1]} : vector<8x96xf32> to vector<8x32xf32>
    %201 = vector.extract_strided_slice %197 {offsets = [0, 64], sizes = [8, 32], strides = [1, 1]} : vector<8x96xf32> to vector<8x32xf32>
    %202 = vector.extract_strided_slice %198 {offsets = [0, 0], sizes = [8, 32], strides = [1, 1]} : vector<8x96xf32> to vector<8x32xf32>
    %203 = vector.extract_strided_slice %198 {offsets = [0, 32], sizes = [8, 32], strides = [1, 1]} : vector<8x96xf32> to vector<8x32xf32>
    %204 = vector.extract_strided_slice %198 {offsets = [0, 64], sizes = [8, 32], strides = [1, 1]} : vector<8x96xf32> to vector<8x32xf32>
    %205 = vector.broadcast %6 : vector<1x32xf32> to vector<8x32xf32>
    %206 = arith.addf %204, %205 : vector<8x32xf32>
    %207 = arith.addf %199, %202 : vector<8x32xf32>
    %208 = arith.negf %207 : vector<8x32xf32>
    %209 = math.exp %208 : vector<8x32xf32>
    %cst_64 = arith.constant 1.000000e+00 : f32
    %210 = vector.broadcast %cst_64 : f32 to vector<8x32xf32>
    %211 = arith.addf %210, %209 : vector<8x32xf32>
    %212 = arith.divf %210, %211 : vector<8x32xf32>
    %213 = arith.addf %200, %203 : vector<8x32xf32>
    %214 = arith.negf %213 : vector<8x32xf32>
    %215 = math.exp %214 : vector<8x32xf32>
    %cst_65 = arith.constant 1.000000e+00 : f32
    %216 = vector.broadcast %cst_65 : f32 to vector<8x32xf32>
    %217 = arith.addf %216, %215 : vector<8x32xf32>
    %218 = arith.divf %216, %217 : vector<8x32xf32>
    %219 = arith.mulf %212, %206 : vector<8x32xf32>
    %220 = arith.addf %201, %219 : vector<8x32xf32>
    %221 = math.tanh %220 : vector<8x32xf32>
    %cst_66 = arith.constant 1.000000e+00 : f32
    %222 = vector.broadcast %cst_66 : f32 to vector<8x32xf32>
    %223 = arith.subf %222, %218 : vector<8x32xf32>
    %224 = arith.mulf %223, %221 : vector<8x32xf32>
    %225 = arith.mulf %218, %189 : vector<8x32xf32>
    %226 = arith.addf %224, %225 : vector<8x32xf32>
    %c5_67 = arith.constant 5 : index
    %c0_68 = arith.constant 0 : index
    %c0_69 = arith.constant 0 : index
    %227 = vector.load %arg6[%c5_67, %c0_68, %c0_69] : memref<8x8x32xf32, #tpu.memory_space<vmem>>, vector<1x8x32xf32>
    %228 = vector.shape_cast %227 : vector<1x8x32xf32> to vector<8x32xf32>
    %229 = vector.shape_cast %226 : vector<8x32xf32> to vector<1x8x32xf32>
    tpu.vector_store %arg6[%c5_67, %c0_68, %c0_69], %229 {strides = array<i32>} : memref<8x8x32xf32, #tpu.memory_space<vmem>>, vector<1x8x32xf32>,
    %c6 = arith.constant 6 : index
    %c0_70 = arith.constant 0 : index
    %c0_71 = arith.constant 0 : index
    %230 = vector.load %arg1[%c6, %c0_70, %c0_71] : memref<8x8x32xf32, #tpu.memory_space<vmem>>, vector<1x8x32xf32>
    %231 = vector.shape_cast %230 : vector<1x8x32xf32> to vector<8x32xf32>
    %cst_72 = arith.constant dense<0.000000e+00> : vector<8x96xf32>
    %232 = tpu.matmul %231, %3, %cst_72 {dimension_numbers = #tpu.dot_dimension_numbers<[1], [0], [0], [1], [0, 0, 1, 1], [], []>} : vector<8x32xf32>, vector<32x96xf32>, vector<8x96xf32> -> vector<8x96xf32>
    %233 = vector.broadcast %5 : vector<1x96xf32> to vector<8x96xf32>
    %234 = arith.addf %232, %233 : vector<8x96xf32>
    %cst_73 = arith.constant dense<0.000000e+00> : vector<8x96xf32>
    %235 = tpu.matmul %226, %4, %cst_73 {dimension_numbers = #tpu.dot_dimension_numbers<[1], [0], [0], [1], [0, 0, 1, 1], [], []>} : vector<8x32xf32>, vector<32x96xf32>, vector<8x96xf32> -> vector<8x96xf32>
    %236 = vector.extract_strided_slice %234 {offsets = [0, 0], sizes = [8, 32], strides = [1, 1]} : vector<8x96xf32> to vector<8x32xf32>
    %237 = vector.extract_strided_slice %234 {offsets = [0, 32], sizes = [8, 32], strides = [1, 1]} : vector<8x96xf32> to vector<8x32xf32>
    %238 = vector.extract_strided_slice %234 {offsets = [0, 64], sizes = [8, 32], strides = [1, 1]} : vector<8x96xf32> to vector<8x32xf32>
    %239 = vector.extract_strided_slice %235 {offsets = [0, 0], sizes = [8, 32], strides = [1, 1]} : vector<8x96xf32> to vector<8x32xf32>
    %240 = vector.extract_strided_slice %235 {offsets = [0, 32], sizes = [8, 32], strides = [1, 1]} : vector<8x96xf32> to vector<8x32xf32>
    %241 = vector.extract_strided_slice %235 {offsets = [0, 64], sizes = [8, 32], strides = [1, 1]} : vector<8x96xf32> to vector<8x32xf32>
    %242 = vector.broadcast %6 : vector<1x32xf32> to vector<8x32xf32>
    %243 = arith.addf %241, %242 : vector<8x32xf32>
    %244 = arith.addf %236, %239 : vector<8x32xf32>
    %245 = arith.negf %244 : vector<8x32xf32>
    %246 = math.exp %245 : vector<8x32xf32>
    %cst_74 = arith.constant 1.000000e+00 : f32
    %247 = vector.broadcast %cst_74 : f32 to vector<8x32xf32>
    %248 = arith.addf %247, %246 : vector<8x32xf32>
    %249 = arith.divf %247, %248 : vector<8x32xf32>
    %250 = arith.addf %237, %240 : vector<8x32xf32>
    %251 = arith.negf %250 : vector<8x32xf32>
    %252 = math.exp %251 : vector<8x32xf32>
    %cst_75 = arith.constant 1.000000e+00 : f32
    %253 = vector.broadcast %cst_75 : f32 to vector<8x32xf32>
    %254 = arith.addf %253, %252 : vector<8x32xf32>
    %255 = arith.divf %253, %254 : vector<8x32xf32>
    %256 = arith.mulf %249, %243 : vector<8x32xf32>
    %257 = arith.addf %238, %256 : vector<8x32xf32>
    %258 = math.tanh %257 : vector<8x32xf32>
    %cst_76 = arith.constant 1.000000e+00 : f32
    %259 = vector.broadcast %cst_76 : f32 to vector<8x32xf32>
    %260 = arith.subf %259, %255 : vector<8x32xf32>
    %261 = arith.mulf %260, %258 : vector<8x32xf32>
    %262 = arith.mulf %255, %226 : vector<8x32xf32>
    %263 = arith.addf %261, %262 : vector<8x32xf32>
    %c6_77 = arith.constant 6 : index
    %c0_78 = arith.constant 0 : index
    %c0_79 = arith.constant 0 : index
    %264 = vector.load %arg6[%c6_77, %c0_78, %c0_79] : memref<8x8x32xf32, #tpu.memory_space<vmem>>, vector<1x8x32xf32>
    %265 = vector.shape_cast %264 : vector<1x8x32xf32> to vector<8x32xf32>
    %266 = vector.shape_cast %263 : vector<8x32xf32> to vector<1x8x32xf32>
    tpu.vector_store %arg6[%c6_77, %c0_78, %c0_79], %266 {strides = array<i32>} : memref<8x8x32xf32, #tpu.memory_space<vmem>>, vector<1x8x32xf32>,
    %c7 = arith.constant 7 : index
    %c0_80 = arith.constant 0 : index
    %c0_81 = arith.constant 0 : index
    %267 = vector.load %arg1[%c7, %c0_80, %c0_81] : memref<8x8x32xf32, #tpu.memory_space<vmem>>, vector<1x8x32xf32>
    %268 = vector.shape_cast %267 : vector<1x8x32xf32> to vector<8x32xf32>
    %cst_82 = arith.constant dense<0.000000e+00> : vector<8x96xf32>
    %269 = tpu.matmul %268, %3, %cst_82 {dimension_numbers = #tpu.dot_dimension_numbers<[1], [0], [0], [1], [0, 0, 1, 1], [], []>} : vector<8x32xf32>, vector<32x96xf32>, vector<8x96xf32> -> vector<8x96xf32>
    %270 = vector.broadcast %5 : vector<1x96xf32> to vector<8x96xf32>
    %271 = arith.addf %269, %270 : vector<8x96xf32>
    %cst_83 = arith.constant dense<0.000000e+00> : vector<8x96xf32>
    %272 = tpu.matmul %263, %4, %cst_83 {dimension_numbers = #tpu.dot_dimension_numbers<[1], [0], [0], [1], [0, 0, 1, 1], [], []>} : vector<8x32xf32>, vector<32x96xf32>, vector<8x96xf32> -> vector<8x96xf32>
    %273 = vector.extract_strided_slice %271 {offsets = [0, 0], sizes = [8, 32], strides = [1, 1]} : vector<8x96xf32> to vector<8x32xf32>
    %274 = vector.extract_strided_slice %271 {offsets = [0, 32], sizes = [8, 32], strides = [1, 1]} : vector<8x96xf32> to vector<8x32xf32>
    %275 = vector.extract_strided_slice %271 {offsets = [0, 64], sizes = [8, 32], strides = [1, 1]} : vector<8x96xf32> to vector<8x32xf32>
    %276 = vector.extract_strided_slice %272 {offsets = [0, 0], sizes = [8, 32], strides = [1, 1]} : vector<8x96xf32> to vector<8x32xf32>
    %277 = vector.extract_strided_slice %272 {offsets = [0, 32], sizes = [8, 32], strides = [1, 1]} : vector<8x96xf32> to vector<8x32xf32>
    %278 = vector.extract_strided_slice %272 {offsets = [0, 64], sizes = [8, 32], strides = [1, 1]} : vector<8x96xf32> to vector<8x32xf32>
    %279 = vector.broadcast %6 : vector<1x32xf32> to vector<8x32xf32>
    %280 = arith.addf %278, %279 : vector<8x32xf32>
    %281 = arith.addf %273, %276 : vector<8x32xf32>
    %282 = arith.negf %281 : vector<8x32xf32>
    %283 = math.exp %282 : vector<8x32xf32>
    %cst_84 = arith.constant 1.000000e+00 : f32
    %284 = vector.broadcast %cst_84 : f32 to vector<8x32xf32>
    %285 = arith.addf %284, %283 : vector<8x32xf32>
    %286 = arith.divf %284, %285 : vector<8x32xf32>
    %287 = arith.addf %274, %277 : vector<8x32xf32>
    %288 = arith.negf %287 : vector<8x32xf32>
    %289 = math.exp %288 : vector<8x32xf32>
    %cst_85 = arith.constant 1.000000e+00 : f32
    %290 = vector.broadcast %cst_85 : f32 to vector<8x32xf32>
    %291 = arith.addf %290, %289 : vector<8x32xf32>
    %292 = arith.divf %290, %291 : vector<8x32xf32>
    %293 = arith.mulf %286, %280 : vector<8x32xf32>
    %294 = arith.addf %275, %293 : vector<8x32xf32>
    %295 = math.tanh %294 : vector<8x32xf32>
    %cst_86 = arith.constant 1.000000e+00 : f32
    %296 = vector.broadcast %cst_86 : f32 to vector<8x32xf32>
    %297 = arith.subf %296, %292 : vector<8x32xf32>
    %298 = arith.mulf %297, %295 : vector<8x32xf32>
    %299 = arith.mulf %292, %263 : vector<8x32xf32>
    %300 = arith.addf %298, %299 : vector<8x32xf32>
    %c7_87 = arith.constant 7 : index
    %c0_88 = arith.constant 0 : index
    %c0_89 = arith.constant 0 : index
    %301 = vector.load %arg6[%c7_87, %c0_88, %c0_89] : memref<8x8x32xf32, #tpu.memory_space<vmem>>, vector<1x8x32xf32>
    %302 = vector.shape_cast %301 : vector<1x8x32xf32> to vector<8x32xf32>
    %303 = vector.shape_cast %300 : vector<8x32xf32> to vector<1x8x32xf32>
    tpu.vector_store %arg6[%c7_87, %c0_88, %c0_89], %303 {strides = array<i32>} : memref<8x8x32xf32, #tpu.memory_space<vmem>>, vector<1x8x32xf32>,
    %c0_90 = arith.constant 0 : index
    %c0_91 = arith.constant 0 : index
    %304 = vector.load %arg7[%c0_90, %c0_91] : memref<8x32xf32, #tpu.memory_space<vmem>>, vector<8x32xf32>
    tpu.vector_store %arg7[%c0_90, %c0_91], %300 {strides = array<i32>} : memref<8x32xf32, #tpu.memory_space<vmem>>, vector<8x32xf32>,
    return
  }
  func.func @transform_0(%arg0: i32) -> (i32, i32, i32) {
    %c0_i32 = arith.constant 0 : i32
    %c0_i32_0 = arith.constant 0 : i32
    %c0_i32_1 = arith.constant 0 : i32
    return %arg0, %c0_i32, %c0_i32_0 : i32, i32, i32
  }
  func.func @transform_1(%arg0: i32) -> (i32, i32) {
    %c0_i32 = arith.constant 0 : i32
    %c0_i32_0 = arith.constant 0 : i32
    %c0_i32_1 = arith.constant 0 : i32
    return %c0_i32, %c0_i32_0 : i32, i32
  }
  func.func @transform_2(%arg0: i32) -> (i32, i32) {
    %c0_i32 = arith.constant 0 : i32
    %c0_i32_0 = arith.constant 0 : i32
    %c0_i32_1 = arith.constant 0 : i32
    return %c0_i32, %c0_i32_0 : i32, i32
  }
  func.func @transform_3(%arg0: i32) -> (i32, i32) {
    %c0_i32 = arith.constant 0 : i32
    %c0_i32_0 = arith.constant 0 : i32
    %c0_i32_1 = arith.constant 0 : i32
    return %c0_i32, %c0_i32_0 : i32, i32
  }
  func.func @transform_4(%arg0: i32) -> (i32, i32) {
    %c0_i32 = arith.constant 0 : i32
    %c0_i32_0 = arith.constant 0 : i32
    %c0_i32_1 = arith.constant 0 : i32
    return %c0_i32, %c0_i32_0 : i32, i32
  }
  func.func @transform_5(%arg0: i32) -> (i32, i32, i32) {
    %c0_i32 = arith.constant 0 : i32
    %c0_i32_0 = arith.constant 0 : i32
    %c0_i32_1 = arith.constant 0 : i32
    return %arg0, %c0_i32, %c0_i32_0 : i32, i32, i32
  }
}

module attributes {stable_mosaic.version = 11 : i64} {
  func.func @_proj_logsoftmax_kernel(%arg0: i32, %arg1: memref<32x32xf32, #tpu.memory_space<vmem>>, %arg2: memref<32x128xf32, #tpu.memory_space<vmem>>, %arg3: memref<1x128xf32, #tpu.memory_space<vmem>>, %arg4: memref<32x128xf32, #tpu.memory_space<vmem>>) attributes {dimension_semantics = [#tpu.dimension_semantics<parallel>], iteration_bounds = array<i64: 1>, scalar_prefetch = 0 : i64, scratch_operands = 0 : i64, tpu.core_type = #tpu.core_type<tc>, window_params = [{transform_indices = @transform_0, window_bounds = array<i64: 32, 32>}, {pipeline_mode = #tpu.pipeline_mode<synchronous>, transform_indices = @transform_1, window_bounds = array<i64: 32, 128>}, {pipeline_mode = #tpu.pipeline_mode<synchronous>, transform_indices = @transform_2, window_bounds = array<i64: 1, 128>}, {transform_indices = @transform_3, window_bounds = array<i64: 32, 128>}]} {
    %c0 = arith.constant 0 : index
    %c0_0 = arith.constant 0 : index
    %0 = vector.load %arg1[%c0, %c0_0] : memref<32x32xf32, #tpu.memory_space<vmem>>, vector<32x32xf32>
    %c0_1 = arith.constant 0 : index
    %c0_2 = arith.constant 0 : index
    %1 = vector.load %arg2[%c0_1, %c0_2] : memref<32x128xf32, #tpu.memory_space<vmem>>, vector<32x128xf32>
    %cst = arith.constant dense<0.000000e+00> : vector<32x128xf32>
    %2 = tpu.matmul %0, %1, %cst {dimension_numbers = #tpu.dot_dimension_numbers<[1], [0], [0], [1], [0, 0, 1, 1], [], []>} : vector<32x32xf32>, vector<32x128xf32>, vector<32x128xf32> -> vector<32x128xf32>
    %c0_3 = arith.constant 0 : index
    %c0_4 = arith.constant 0 : index
    %3 = vector.load %arg3[%c0_3, %c0_4] : memref<1x128xf32, #tpu.memory_space<vmem>>, vector<1x128xf32>
    %4 = vector.broadcast %3 : vector<1x128xf32> to vector<32x128xf32>
    %5 = arith.addf %2, %4 : vector<32x128xf32>
    %cst_5 = arith.constant dense<0xFF800000> : vector<32xf32>
    %6 = vector.multi_reduction <maximumf>, %5, %cst_5 [1] : vector<32x128xf32> to vector<32xf32>
    %7 = vector.shape_cast %6 : vector<32xf32> to vector<32x1xf32>
    %8 = vector.broadcast %7 : vector<32x1xf32> to vector<32x128xf32>
    %9 = arith.subf %5, %8 : vector<32x128xf32>
    %10 = math.exp %9 : vector<32x128xf32>
    %cst_6 = arith.constant dense<0.000000e+00> : vector<32xf32>
    %11 = vector.multi_reduction <add>, %10, %cst_6 [1] : vector<32x128xf32> to vector<32xf32>
    %12 = vector.shape_cast %11 : vector<32xf32> to vector<32x1xf32>
    %13 = math.log %12 : vector<32x1xf32>
    %14 = arith.addf %7, %13 : vector<32x1xf32>
    %15 = vector.broadcast %14 : vector<32x1xf32> to vector<32x128xf32>
    %16 = arith.subf %5, %15 : vector<32x128xf32>
    %c0_7 = arith.constant 0 : index
    %c0_8 = arith.constant 0 : index
    %17 = vector.load %arg4[%c0_7, %c0_8] : memref<32x128xf32, #tpu.memory_space<vmem>>, vector<32x128xf32>
    tpu.vector_store %arg4[%c0_7, %c0_8], %16 {strides = array<i32>} : memref<32x128xf32, #tpu.memory_space<vmem>>, vector<32x128xf32>,
    return
  }
  func.func @transform_0(%arg0: i32) -> (i32, i32) {
    %c0_i32 = arith.constant 0 : i32
    %c0_i32_0 = arith.constant 0 : i32
    return %arg0, %c0_i32 : i32, i32
  }
  func.func @transform_1(%arg0: i32) -> (i32, i32) {
    %c0_i32 = arith.constant 0 : i32
    %c0_i32_0 = arith.constant 0 : i32
    %c0_i32_1 = arith.constant 0 : i32
    return %c0_i32, %c0_i32_0 : i32, i32
  }
  func.func @transform_2(%arg0: i32) -> (i32, i32) {
    %c0_i32 = arith.constant 0 : i32
    %c0_i32_0 = arith.constant 0 : i32
    %c0_i32_1 = arith.constant 0 : i32
    return %c0_i32, %c0_i32_0 : i32, i32
  }
  func.func @transform_3(%arg0: i32) -> (i32, i32) {
    %c0_i32 = arith.constant 0 : i32
    %c0_i32_0 = arith.constant 0 : i32
    return %arg0, %c0_i32 : i32, i32
  }
}

</mosaic_0001>

<bundles_post_ra>
// kernel: lm_forward.3
= control target key start
LH: loop header
LB: loop body
LE: loop exit
PB: predicated region body
PF: predicated region fallthrough
CT: control target
= control target key end

     0   :  { %vm30_vm0 = vcmask 261120   ;;  %s340_s0 = inlined_call_operand.vmem [shape: f32[32,32], index: 0, kind: input, shape index: {}]   ;;  %s341_s1 = inlined_call_operand.vmem [shape: f32[32,128], index: 1, kind: input, shape index: {}]   ;;  %s342_s2 = inlined_call_operand.vmem [shape: f32[1,128], index: 2, kind: input, shape index: {}]   ;;  %s343_s3 = inlined_call_operand.hbm [shape: f32[32,128], index: 3, kind: output, shape index: {}]  }
   0x1   :  { %v19_v0 = vld [vmem:[%s341_s1] sm:$0xff]  ;;  %v20_v1 = vld [vmem:[%s341_s1 + $0x8] sm:$0xff]  ;;  %v21_v2 = vld [vmem:[%s341_s1 + $0x10] sm:$0xff] }
   0x2   :  { %v219_v3 = vpack.c.bf16 %v20_v1, %v19_v0  ;;  %v22_v4 = vld [vmem:[%s341_s1 + $0x18] sm:$0xff]  ;;  %v15_v5 = vld [vmem:[%s340_s0] sm:$0xff]  ;;  %v17_v6 = vld [vmem:[%s340_s0 + $0x10] sm:$0xff] }
   0x3   :  { %v223_v7 = vpack.c.bf16 %v22_v4, %v21_v2  ;;  %213 = vmatprep.mubr.msk.f32.mxu0 %vm30_vm0, %v15_v5  ;;  %216 = vmatprep.mubr.msk.f32.mxu1 %vm30_vm0, %v17_v6 }
   0x4   :  { %8 = vsyncpa [#allocation3], 0  ;;  %220 = vmatprep.subr.bf16.mxu0 %v219_v3  ;;  %227 = vmatprep.subr.bf16.mxu1 %v219_v3  ;;  %v16_v8 = vld [vmem:[%s340_s0 + $0x8] sm:$0xff]  ;;  %v18_v9 = vld [vmem:[%s340_s0 + $0x18] sm:$0xff]  ;;  %s274_s0 = smov [#allocation2]  }
   0x5   :  { %222 = vmatpush3.bf16.msra.mxu0 %v219_v3  ;;  %229 = vmatpush3.bf16.msra.mxu1 %v219_v3  ;;  %v192_v10 = vld [vmem:[%s342_s2] ss:$0 sm:$0xff]  ;;  %s181_s2 = sshll.u32 %s274_s0, 4  ;;  %s182_s2 = int_to_ptr.vmem [resolvable:$true] %s181_s2 }
   0x6   :  { %224 = vmatprep.subr.bf16.mxu0 %v223_v7  ;;  %228 = vmatprep.subr.bf16.mxu1 %v223_v7  ;;  %s250_s29 = scalar_lea.vmem %s182_s2, 512  ;;  %p255_p1 = scmp.lt.s32.totalorder %s182_s2, %s182_s2 }
   0x7   :  { %p251_p0 = scmp.ne.s32.totalorder %s182_s2, %s250_s29  ;;  %p256_p2 = scmp.lt.s32.totalorder %s250_s29, %s250_s29 }
   0x9   :  { %226 = vmatpush3.bf16.msra.mxu0 %v223_v7  ;;  %230 = vmatpush3.bf16.msra.mxu1 %v223_v7  ;;  %p257_p3 = por %p256_p2, %p255_p1 }
   0xb   :  { %p258_p4 = pnand %p257_p3, %p251_p0 }
   0xc   :  { %214 = vmatmul.mubr.msk.f32.vlgmr.msra.gmra.mrb[0].mxu0 %vm30_vm0, %v16_v8  ;;  %217 = vmatmul.mubr.msk.f32.vlgmr.msra.gmra.mrb[0].mxu1 %vm30_vm0, %v18_v9 }
  0xdf   :  { %v215_v11 = vpop.f32.mrb[0].mxu0  ;;  %v218_v12 = vpop.f32.mrb[0].mxu1 }
  0xe0   :  { %v109_v13 = vpop.f32.mrb[1].mxu0  ;;  %v119_v14 = vpop.f32.mrb[1].mxu1  ;;  %v125_v17 = vadd.f32 %v218_v12, %v192_v10  ;;  %v115_v18 = vadd.f32 %v215_v11, %v192_v10 }
  0xe1   :  { %v110_v15 = vadd.f32 %v192_v10, %v109_v13  ;;  %v120_v16 = vadd.f32 %v192_v10, %v119_v14 }
  0xe3   :  { %132 = vmax.xlane.f32.xlu1 %v120_v16  ;;  %128 = vmax.xlane.f32.xlu0 %v110_v15 }
  0xe7   :  { %134 = vmax.xlane.f32.xlu1 %v125_v17  ;;  %130 = vmax.xlane.f32.xlu0 %v115_v18 }
 0x170   :  { %v133_v19 = vpop.xlane.xlu1 %132  ;;  %v129_v20 = vpop.xlane.xlu0 %128 }
 0x171   :  { %v138_v21 = vsub.f32 %v120_v16, %v133_v19  ;;  %v136_v22 = vsub.f32 %v110_v15, %v129_v20 }
 0x173   :  { %v140_v23 = vmul.f32 1.442695, %v136_v22  ;;  %v144_v26 = vmul.f32 1.442695, %v138_v21 }
 0x174   :  { %v135_v24 = vpop.xlane.xlu1 %134  ;;  %v131_v25 = vpop.xlane.xlu0 %130 }
 0x175   :  { %v137_v27 = vsub.f32 %v115_v18, %v131_v25  ;;  %234 = vpow2.f32 %v140_v23  ;;  %v139_v28 = vsub.f32 %v125_v17, %v135_v24 }
 0x176   :  { %236 = vpow2.f32 %v144_v26 }
 0x177   :  { %v142_v29 = vmul.f32 1.442695, %v137_v27  ;;  %v146_v30 = vmul.f32 1.442695, %v139_v28 }
 0x179   :  { %238 = vpow2.f32 %v142_v29 }
 0x17a   :  { %240 = vpow2.f32 %v146_v30 }
 0x17f   :  { %v235_v31 = vpop.eup %234 }
 0x180   :  { %148 = vadd.xlane.f32.xlu0 %v235_v31  ;;  %v237_v32 = vpop.eup %236 }
 0x183   :  { %v239_v33 = vpop.eup %238 }
 0x184   :  { %152 = vadd.xlane.f32.xlu0 %v237_v32  ;;  %150 = vadd.xlane.f32.xlu1 %v239_v33  ;;  %v241_v34 = vpop.eup %240 }
 0x188   :  { %154 = vadd.xlane.f32.xlu1 %v241_v34 }
 0x20d   :  { %v149_v35 = vpop.xlane.xlu0 %148 }
 0x20e   :  { %242 = vlog2.f32 %v149_v35 }
 0x211   :  { %v151_v36 = vpop.xlane.xlu1 %150  ;;  %v153_v37 = vpop.xlane.xlu0 %152 }
 0x212   :  { %244 = vlog2.f32 %v151_v36 }
 0x213   :  { %246 = vlog2.f32 %v153_v37 }
 0x215   :  { %v155_v38 = vpop.xlane.xlu1 %154 }
 0x216   :  { %248 = vlog2.f32 %v155_v38 }
 0x218   :  { %v243_v39 = vpop.eup %242 }
 0x219   :  { %v157_v40 = vmul.f32 0.6931472, %v243_v39 }
 0x21b   :  { %v164_v41 = vadd.f32 %v157_v40, %v129_v20 }
 0x21c   :  { %v245_v42 = vpop.eup %244 }
 0x21d   :  { %v247_v43 = vpop.eup %246  ;;  %v168_v44 = vsub.f32 %v110_v15, %v164_v41  ;;  %v159_v45 = vmul.f32 0.6931472, %v245_v42 }
 0x21e   :  { %v161_v46 = vmul.f32 0.6931472, %v247_v43 }
 0x21f   :  { %172 = vst [vmem:[#allocation2] sm:$0xff] %v168_v44  ;;  %v165_v47 = vadd.f32 %v159_v45, %v131_v25 }
 0x220   :  { %v249_v48 = vpop.eup %248  ;;  %v166_v49 = vadd.f32 %v161_v46, %v133_v19 }
 0x221   :  { %v169_v50 = vsub.f32 %v115_v18, %v165_v47  ;;  %v163_v51 = vmul.f32 0.6931472, %v249_v48 }
 0x222   :  { %v170_v52 = vsub.f32 %v120_v16, %v166_v49 }
 0x223   :  { %173 = vst [vmem:[#allocation2 + $0x8] sm:$0xff] %v169_v50  ;;  %v167_v53 = vadd.f32 %v163_v51, %v135_v24 }
 0x224   :  { %174 = vst [vmem:[#allocation2 + $0x10] sm:$0xff] %v170_v52 }
 0x225   :  { %v171_v54 = vsub.f32 %v125_v17, %v167_v53 }
 0x227   :  { %175 = vst [vmem:[#allocation2 + $0x18] sm:$0xff] %v171_v54 }
 0x228   :  { %261 = shalt.err (!%p258_p4)
}
 0x229   :  { %s262_s5 = scalar_lea.hbm %s343_s3, 512 }
 0x22a   :  { %p263_p5 = scmp.ne.s32.totalorder %s343_s3, %s262_s5  ;;  %p266_p6 = scmp.lt.u32.totalorder %s262_s5, %s343_s3 }
 0x22c   :  { %p268_p7 = pnand %p266_p6, %p263_p5 }
 0x22e   :  { %271 = shalt.err (!%p268_p7)
}
 0x22f   :  { %s275_s10 = smov 128   ;;  %s276_s11 = smov 8  }
 0x230   :  { %187 = dma.vmem_to_hbm [thread:$0]  %s182_s2, 512, %s343_s3, [#allocation3], %s275_s10, %s275_s10, %s276_s11  }
 0x231   :  { %272 = dma.done.wait [#allocation3], 512  }
 0x232   :  { %273 = vsyncadd [#allocation3], 4294966784 }
 0x233   :  { %191 = vsyncpa [#allocation3], 1 }

// kernel: lm_forward.2
= control target key start
LH: loop header
LB: loop body
LE: loop exit
PB: predicated region body
PF: predicated region fallthrough
CT: control target
= control target key end

     0   :  { %vm24_vm0 = vcmask 261120   ;;  %v1945_v0 = vmov 0.0|0.0   ;;  %v1946_v4 = vmov 0.0   ;;  %vm1947_vm1 = vmmov 0   ;;  %s1948_s10 = smov 64   ;;  %s2243_s1 = inlined_call_operand.vmem [shape: f32[32,96], index: 1, kind: input, shape index: {}]   ;;  %s2244_s2 = inlined_call_operand.vmem [shape: f32[32,96], index: 2, kind: input, shape index: {}]   ;;  %s2245_s4 = inlined_call_operand.vmem [shape: f32[1,32], index: 4, kind: input, shape index: {}]   ;;  %s2246_s0 = inlined_call_operand.vmem [shape: f32[8,8,32], index: 0, kind: input, shape index: {}]   ;;  %s2247_s3 = inlined_call_operand.vmem [shape: f32[1,96], index: 3, kind: input, shape index: {}]   ;;  %s2248_s5 = inlined_call_operand.vmem [shape: f32[8,8,32], index: 5, kind: output, shape index: {}]  }
   0x1   :  { %1795 = vmatprep.subr.bf16.mxu0 %v1945_v0  ;;  %1801 = vmatprep.subr.bf16.mxu1 %v1945_v0  ;;  %v26_v1 = vld [vmem:[%s2243_s1] sm:$0xff]  ;;  %v27_v2 = vld [vmem:[%s2243_s1 + $0x8] sm:$0xff]  ;;  %25 = vst.msk [vmem:[#allocation2] sm:$0xff] %vm24_vm0, %v1946_v4  ;;  %v28_v7 = vld [vmem:[%s2243_s1 + $0x10] sm:$0xff] }
   0x2   :  { %v30_v3 = vld [vmem:[%s2244_s2] sm:$0xff]  ;;  %v1994_v5 = vpack.c.bf16 %v27_v2, %v26_v1  ;;  %v31_v6 = vld [vmem:[%s2244_s2 + $0x8] sm:$0xff]  ;;  %v29_v8 = vld [vmem:[%s2243_s1 + $0x18] sm:$0xff]  ;;  %1627 = vmatprep.mubr.msk.f32.mxu0 %vm1947_vm1, %v1946_v4  ;;  %1638 = vmatprep.mubr.msk.f32.mxu1 %vm1947_vm1, %v1946_v4 }
   0x3   :  { %v2009_v9 = vpack.c.bf16 %v31_v6, %v30_v3  ;;  %v32_v10 = vld [vmem:[%s2244_s2 + $0x10] sm:$0xff]  ;;  %v33_v11 = vld [vmem:[%s2244_s2 + $0x18] sm:$0xff]  ;;  %v2018_v12 = vpack.c.bf16 %v29_v8, %v28_v7  ;;  %v1502_v13 = vld [vmem:[%s2245_s4] ss:$0 sm:$0xff]  ;;  %s1949_s4 = smov 32  }
   0x4   :  { %1797 = vmatpush3.bf16.msra.mxu0 %v1994_v5  ;;  %v2025_v14 = vpack.c.bf16 %v33_v11, %v32_v10  ;;  %196 = vrot.lane.b32.xlu0 %v1502_v13, %s1948_s10  ;;  %v37_v15 = vld [vmem:[%s2246_s0] sm:$0xff]  ;;  %v1504_v34 = vld [vmem:[%s2246_s0 + $0x8] sm:$0xff]  ;;  %v1509_v58 = vld [vmem:[%s2246_s0 + $0x10] sm:$0xff] }
   0x5   :  { %1803 = vmatpush3.bf16.msra.mxu1 %v2009_v9  ;;  %1798 = vmatprep.subr.bf16.mxu0 %v1945_v0  ;;  %v2057_v23 = vld [vmem:[%s2247_s3] ss:$0 sm:$0xff]  ;;  %s1950_s3 = smov 96  }
   0x6   :  { %1804 = vmatprep.subr.bf16.mxu1 %v1945_v0 }
   0x8   :  { %1800 = vmatpush3.bf16.msra.mxu0 %v2018_v12  ;;  %v36_v16 = vld [vmem:[#allocation2] sm:$0xff] }
   0x9   :  { %1806 = vmatpush3.bf16.msra.mxu1 %v2025_v14  ;;  %1807 = vmatprep.subr.bf16.mxu0 %v1945_v0 }
   0xa   :  { %1813 = vmatprep.subr.bf16.mxu1 %v1945_v0 }
   0xb   :  { %1628 = vmatmul.mubr.msk.f32.vlgmr.msra.gmra.mrb[0].mxu0 %vm24_vm0, %v37_v15 }
   0xc   :  { %1639 = vmatmul.mubr.msk.f32.vlgmr.msra.gmra.mrb[0].mxu1 %vm24_vm0, %v36_v16  ;;  %1809 = vmatpush3.bf16.msra.mxu0 %v1994_v5 }
   0xd   :  { %1815 = vmatpush3.bf16.msra.mxu1 %v2009_v9  ;;  %1810 = vmatprep.subr.bf16.mxu0 %v1945_v0 }
   0xe   :  { %1816 = vmatprep.subr.bf16.mxu1 %v1945_v0  ;;  %1649 = vmatprep.mubr.msk.f32.mxu0 %vm1947_vm1, %v1946_v4 }
   0xf   :  { %1660 = vmatprep.mubr.msk.f32.mxu1 %vm1947_vm1, %v1946_v4 }
  0x10   :  { %1812 = vmatpush3.bf16.msra.mxu0 %v2018_v12 }
  0x11   :  { %1818 = vmatpush3.bf16.msra.mxu1 %v2025_v14  ;;  %1819 = vmatprep.subr.bf16.mxu0 %v1945_v0 }
  0x12   :  { %1825 = vmatprep.subr.bf16.mxu1 %v1945_v0 }
  0x13   :  { %1650 = vmatmul.mubr.msk.f32.vlgmr.msra.gmra.mrb[2].mxu0 %vm24_vm0, %v1504_v34 }
  0x14   :  { %1821 = vmatpush3.bf16.msra.mxu0 %v1994_v5  ;;  %1671 = vmatprep.mubr.msk.f32.mxu0 %vm1947_vm1, %v1946_v4 }
  0x15   :  { %1822 = vmatprep.subr.bf16.mxu0 %v1945_v0 }
  0x18   :  { %1824 = vmatpush3.bf16.msra.mxu0 %v2018_v12 }
  0x19   :  { %1831 = vmatprep.subr.bf16.mxu0 %v1945_v0 }
  0x1b   :  { %1672 = vmatmul.mubr.msk.f32.vlgmr.msra.gmra.mrb[4].mxu0 %vm24_vm0, %v1509_v58 }
  0x1c   :  { %1833 = vmatpush3.bf16.msra.mxu0 %v1994_v5  ;;  %1693 = vmatprep.mubr.msk.f32.mxu0 %vm1947_vm1, %v1946_v4 }
  0x1d   :  { %1834 = vmatprep.subr.bf16.mxu0 %v1945_v0 }
  0x20   :  { %1836 = vmatpush3.bf16.msra.mxu0 %v2018_v12 }
  0x21   :  { %1843 = vmatprep.subr.bf16.mxu0 %v1945_v0 }
  0x76   :  { %v2050_v17 = vpop.permute.xlu0 %196 }
  0xde   :  { %v114_v18 = vpop.f32.mrb[0].mxu0 }
  0xdf   :  { %v187_v19 = vpop.f32.mrb[0].mxu1  ;;  %v1629_v20 = vpop.f32.mrb[1].mxu0  ;;  %v115_v24 = vadd.f32 %v2057_v23, %v114_v18 }
  0xe0   :  { %v199_v21 = vadd.f32 %v2050_v17, %v187_v19  ;;  %v1640_v22 = vpop.f32.mrb[1].mxu1 }
  0xe1   :  { %v200_v25 = vadd.f32 %v187_v19, %v115_v24 }
  0xe2   :  { %208 = vrot.lane.b32.xlu0 %v199_v21, %s1948_s10 }
  0xe3   :  { %v1503_v26 = vmul.f32 -1.442695, %v200_v25  ;;  %v1514_v25 = vld [vmem:[%s2246_s0 + $0x18] sm:$0xff] }
  0xe4   :  { %1694 = vmatmul.mubr.msk.f32.vlgmr.msra.gmra.mrb[6].mxu0 %vm24_vm0, %v1514_v25 }
  0xe5   :  { %1897 = vpow2.f32 %v1503_v26  ;;  %1845 = vmatpush3.bf16.msra.mxu0 %v1994_v5  ;;  %1715 = vmatprep.mubr.msk.f32.mxu0 %vm1947_vm1, %v1946_v4 }
  0xe6   :  { %224 = vrot.lane.b32.xlu0 %v36_v16, %s1949_s4  ;;  %v305_v42 = vpop.f32.mrb[2].mxu0  ;;  %1846 = vmatprep.subr.bf16.mxu0 %v1945_v0 }
  0xe7   :  { %v1651_v43 = vpop.f32.mrb[3].mxu0  ;;  %v306_v48 = vadd.f32 %v2057_v23, %v305_v42 }
  0xe9   :  { %1848 = vmatpush3.bf16.msra.mxu0 %v2018_v12 }
  0xea   :  { %1855 = vmatprep.subr.bf16.mxu0 %v1945_v0 }
  0xee   :  { %v485_v2 = vpop.f32.mrb[4].mxu0 }
  0xef   :  { %v1898_v27 = vpop.eup %1897  ;;  %v1673_v3 = vpop.f32.mrb[5].mxu0  ;;  %v486_v11 = vadd.f32 %v2057_v23, %v485_v2 }
  0xf0   :  { %v204_v28 = vadd.f32 1.0, %v1898_v27 }
  0xf2   :  { %1899 = vrcp.f32 %v204_v28 }
  0xfc   :  { %v1900_v29 = vpop.eup %1899 }
  0xfd   :  { %v218_v37 = vsub.f32 1.0, %v1900_v29 }
 0x154   :  { %v209_v30 = vpop.permute.xlu0 %208 }
 0x155   :  { %v211_v31 = vmul.f32 %v1900_v29, %v209_v30 }
 0x157   :  { %213 = vrot.lane.b32.xlu1 %v211_v31, %s1948_s10 }
 0x158   :  { %v225_v36 = vpop.permute.xlu0 %224 }
 0x159   :  { %v227_v39 = vmul.f32 %v1900_v29, %v225_v36 }
 0x1c9   :  { %v214_v32 = vpop.permute.xlu1 %213 }
 0x1ca   :  { %v216_v33 = vadd.f32 %v214_v32, %v115_v24  ;;  %v665_v32 = vpop.f32.mrb[6].mxu0 }
 0x1cc   :  { %1901 = vtanh.f32 %v216_v33  ;;  %v1695_v33 = vpop.f32.mrb[7].mxu0 }
 0x1d6   :  { %v1902_v35 = vpop.eup %1901 }
 0x1d7   :  { %220 = vrot.lane.b32.xlu1 %v1902_v35, %s1950_s3 }
 0x249   :  { %v221_v38 = vpop.permute.xlu1 %220 }
 0x24a   :  { %v223_v40 = vmul.f32 %v221_v38, %v218_v37  ;;  %v666_v38 = vadd.f32 %v2057_v23, %v665_v32 }
 0x24c   :  { %v228_v41 = vadd.f32 %v227_v39, %v223_v40 }
 0x24e   :  { %230 = vrot.lane.b32.xlu1 %v228_v41, %s1950_s3 }
 0x2c0   :  { %v231_v44 = vpop.permute.xlu1 %230 }
 0x2c1   :  { %233 = vst.msk [vmem:[%s2248_s5] sm:$0xff] %vm24_vm0, %v231_v44  ;;  %1661 = vmatmul.mubr.msk.f32.vlgmr.msra.gmra.mrb[2].mxu1 %vm24_vm0, %v231_v44 }
 0x2c2   :  { %1827 = vmatpush3.bf16.msra.mxu1 %v2009_v9  ;;  %1682 = vmatprep.mubr.msk.f32.mxu1 %vm1947_vm1, %v1946_v4 }
 0x2c3   :  { %1828 = vmatprep.subr.bf16.mxu1 %v1945_v0 }
 0x2c6   :  { %1830 = vmatpush3.bf16.msra.mxu1 %v2025_v14 }
 0x2c7   :  { %1837 = vmatprep.subr.bf16.mxu1 %v1945_v0 }
 0x394   :  { %v377_v45 = vpop.f32.mrb[2].mxu1 }
 0x395   :  { %v381_v46 = vadd.f32 %v377_v45, %v2050_v17  ;;  %v1662_v47 = vpop.f32.mrb[3].mxu1  ;;  %v382_v49 = vadd.f32 %v377_v45, %v306_v48 }
 0x397   :  { %390 = vrot.lane.b32.xlu0 %v381_v46, %s1948_s10  ;;  %v1507_v50 = vmul.f32 -1.442695, %v382_v49 }
 0x399   :  { %1903 = vpow2.f32 %v1507_v50 }
 0x3a3   :  { %v1904_v51 = vpop.eup %1903 }
 0x3a4   :  { %v386_v52 = vadd.f32 1.0, %v1904_v51 }
 0x3a6   :  { %1905 = vrcp.f32 %v386_v52 }
 0x3b0   :  { %v1906_v53 = vpop.eup %1905 }
 0x3b1   :  { %v400_v60 = vsub.f32 1.0, %v1906_v53  ;;  %v406_v62 = vmul.f32 %v1906_v53, %v228_v41 }
 0x409   :  { %v391_v54 = vpop.permute.xlu0 %390 }
 0x40a   :  { %v393_v55 = vmul.f32 %v1906_v53, %v391_v54 }
 0x40c   :  { %395 = vrot.lane.b32.xlu1 %v393_v55, %s1948_s10 }
 0x47e   :  { %v396_v56 = vpop.permute.xlu1 %395 }
 0x47f   :  { %v398_v57 = vadd.f32 %v396_v56, %v306_v48  ;;  %v1519_v48 = vld [vmem:[%s2246_s0 + $0x20] sm:$0xff] }
 0x480   :  { %1716 = vmatmul.mubr.msk.f32.vlgmr.msra.gmra.mrb[8].mxu0 %vm24_vm0, %v1519_v48 }
 0x481   :  { %1907 = vtanh.f32 %v398_v57  ;;  %1857 = vmatpush3.bf16.msra.mxu0 %v1994_v5  ;;  %1737 = vmatprep.mubr.msk.f32.mxu0 %vm1947_vm1, %v1946_v4 }
 0x482   :  { %1858 = vmatprep.subr.bf16.mxu0 %v1945_v0 }
 0x485   :  { %1860 = vmatpush3.bf16.msra.mxu0 %v2018_v12 }
 0x486   :  { %1867 = vmatprep.subr.bf16.mxu0 %v1945_v0 }
 0x48b   :  { %v1908_v59 = vpop.eup %1907 }
 0x48c   :  { %402 = vrot.lane.b32.xlu0 %v1908_v59, %s1950_s3 }
 0x4fe   :  { %v403_v61 = vpop.permute.xlu0 %402 }
 0x4ff   :  { %v405_v63 = vmul.f32 %v403_v61, %v400_v60 }
 0x501   :  { %v407_v1 = vadd.f32 %v406_v62, %v405_v63 }
 0x503   :  { %409 = vrot.lane.b32.xlu1 %v407_v1, %s1950_s3 }
 0x553   :  { %v845_v55 = vpop.f32.mrb[8].mxu0 }
 0x554   :  { %v1717_v56 = vpop.f32.mrb[9].mxu0  ;;  %v846_v61 = vadd.f32 %v2057_v23, %v845_v55  ;;  %v1534_v55 = vld [vmem:[%s2246_s0 + $0x38] sm:$0xff] }
 0x575   :  { %v410_v6 = vpop.permute.xlu1 %409 }
 0x576   :  { %1508 = vst.msk [vmem:[%s2248_s5 + $0x8] sm:$0xff] %vm24_vm0, %v410_v6  ;;  %1683 = vmatmul.mubr.msk.f32.vlgmr.msra.gmra.mrb[4].mxu1 %vm24_vm0, %v410_v6 }
 0x577   :  { %1839 = vmatpush3.bf16.msra.mxu1 %v2009_v9  ;;  %1704 = vmatprep.mubr.msk.f32.mxu1 %vm1947_vm1, %v1946_v4 }
 0x578   :  { %1840 = vmatprep.subr.bf16.mxu1 %v1945_v0 }
 0x57b   :  { %1842 = vmatpush3.bf16.msra.mxu1 %v2025_v14 }
 0x57c   :  { %1849 = vmatprep.subr.bf16.mxu1 %v1945_v0 }
 0x649   :  { %v557_v7 = vpop.f32.mrb[4].mxu1 }
 0x64a   :  { %v561_v8 = vadd.f32 %v557_v7, %v2050_v17  ;;  %v1684_v10 = vpop.f32.mrb[5].mxu1  ;;  %v562_v13 = vadd.f32 %v557_v7, %v486_v11 }
 0x64c   :  { %570 = vrot.lane.b32.xlu0 %v561_v8, %s1948_s10  ;;  %v1512_v15 = vmul.f32 -1.442695, %v562_v13 }
 0x64e   :  { %1909 = vpow2.f32 %v1512_v15 }
 0x658   :  { %v1910_v16 = vpop.eup %1909 }
 0x659   :  { %v566_v18 = vadd.f32 1.0, %v1910_v16 }
 0x65b   :  { %1911 = vrcp.f32 %v566_v18 }
 0x665   :  { %v1912_v19 = vpop.eup %1911 }
 0x666   :  { %v580_v27 = vsub.f32 1.0, %v1912_v19  ;;  %v586_v29 = vmul.f32 %v1912_v19, %v407_v1 }
 0x6be   :  { %v571_v20 = vpop.permute.xlu0 %570 }
 0x6bf   :  { %v573_v21 = vmul.f32 %v1912_v19, %v571_v20 }
 0x6c1   :  { %575 = vrot.lane.b32.xlu1 %v573_v21, %s1948_s10 }
 0x733   :  { %v576_v22 = vpop.permute.xlu1 %575 }
 0x734   :  { %v578_v24 = vadd.f32 %v576_v22, %v486_v11  ;;  %v1524_v11 = vld [vmem:[%s2246_s0 + $0x28] sm:$0xff] }
 0x735   :  { %1738 = vmatmul.mubr.msk.f32.vlgmr.msra.gmra.mrb[10].mxu0 %vm24_vm0, %v1524_v11 }
 0x736   :  { %1913 = vtanh.f32 %v578_v24  ;;  %1869 = vmatpush3.bf16.msra.mxu0 %v1994_v5  ;;  %1759 = vmatprep.mubr.msk.f32.mxu0 %vm1947_vm1, %v1946_v4 }
 0x737   :  { %1870 = vmatprep.subr.bf16.mxu0 %v1945_v0 }
 0x73a   :  { %1872 = vmatpush3.bf16.msra.mxu0 %v2018_v12 }
 0x73b   :  { %1879 = vmatprep.subr.bf16.mxu0 %v1945_v0 }
 0x740   :  { %v1914_v26 = vpop.eup %1913 }
 0x741   :  { %582 = vrot.lane.b32.xlu0 %v1914_v26, %s1950_s3 }
 0x7b3   :  { %v583_v28 = vpop.permute.xlu0 %582 }
 0x7b4   :  { %v585_v30 = vmul.f32 %v583_v28, %v580_v27 }
 0x7b6   :  { %v587_v31 = vadd.f32 %v586_v29, %v585_v30 }
 0x7b8   :  { %589 = vrot.lane.b32.xlu1 %v587_v31, %s1950_s3 }
 0x808   :  { %v1025_v21 = vpop.f32.mrb[10].mxu0 }
 0x809   :  { %v1739_v22 = vpop.f32.mrb[11].mxu0  ;;  %v1026_v28 = vadd.f32 %v2057_v23, %v1025_v21 }
 0x82a   :  { %v590_v34 = vpop.permute.xlu1 %589 }
 0x82b   :  { %1513 = vst.msk [vmem:[%s2248_s5 + $0x10] sm:$0xff] %vm24_vm0, %v590_v34  ;;  %1705 = vmatmul.mubr.msk.f32.vlgmr.msra.gmra.mrb[6].mxu1 %vm24_vm0, %v590_v34 }
 0x82c   :  { %1851 = vmatpush3.bf16.msra.mxu1 %v2009_v9  ;;  %1726 = vmatprep.mubr.msk.f32.mxu1 %vm1947_vm1, %v1946_v4 }
 0x82d   :  { %1852 = vmatprep.subr.bf16.mxu1 %v1945_v0 }
 0x830   :  { %1854 = vmatpush3.bf16.msra.mxu1 %v2025_v14 }
 0x831   :  { %1861 = vmatprep.subr.bf16.mxu1 %v1945_v0 }
 0x8fe   :  { %v737_v35 = vpop.f32.mrb[6].mxu1 }
 0x8ff   :  { %v741_v36 = vadd.f32 %v737_v35, %v2050_v17  ;;  %v1706_v37 = vpop.f32.mrb[7].mxu1  ;;  %v742_v39 = vadd.f32 %v737_v35, %v666_v38 }
 0x901   :  { %750 = vrot.lane.b32.xlu0 %v741_v36, %s1948_s10  ;;  %v1517_v40 = vmul.f32 -1.442695, %v742_v39 }
 0x903   :  { %1915 = vpow2.f32 %v1517_v40 }
 0x90d   :  { %v1916_v41 = vpop.eup %1915 }
 0x90e   :  { %v746_v42 = vadd.f32 1.0, %v1916_v41 }
 0x910   :  { %1917 = vrcp.f32 %v746_v42 }
 0x91a   :  { %v1918_v43 = vpop.eup %1917 }
 0x91b   :  { %v760_v50 = vsub.f32 1.0, %v1918_v43  ;;  %v766_v52 = vmul.f32 %v1918_v43, %v587_v31 }
 0x973   :  { %v751_v44 = vpop.permute.xlu0 %750 }
 0x974   :  { %v753_v45 = vmul.f32 %v1918_v43, %v751_v44 }
 0x976   :  { %755 = vrot.lane.b32.xlu1 %v753_v45, %s1948_s10 }
 0x9e8   :  { %v756_v46 = vpop.permute.xlu1 %755 }
 0x9e9   :  { %v758_v47 = vadd.f32 %v756_v46, %v666_v38  ;;  %v1529_v38 = vld [vmem:[%s2246_s0 + $0x30] sm:$0xff] }
 0x9ea   :  { %1760 = vmatmul.mubr.msk.f32.vlgmr.msra.gmra.mrb[12].mxu0 %vm24_vm0, %v1529_v38 }
 0x9eb   :  { %1919 = vtanh.f32 %v758_v47  ;;  %1881 = vmatpush3.bf16.msra.mxu0 %v1994_v5  ;;  %1781 = vmatprep.mubr.msk.f32.mxu0 %vm1947_vm1, %v1946_v4 }
 0x9ec   :  { %1882 = vmatprep.subr.bf16.mxu0 %v1945_v0 }
 0x9ef   :  { %1884 = vmatpush3.bf16.msra.mxu0 %v2018_v12 }
 0x9f2   :  { %1782 = vmatmul.mubr.msk.f32.vlgmr.msra.gmra.mrb[14].mxu0 %vm24_vm0, %v1534_v55 }
 0x9f5   :  { %v1920_v49 = vpop.eup %1919 }
 0x9f6   :  { %762 = vrot.lane.b32.xlu0 %v1920_v49, %s1950_s3 }
 0xa68   :  { %v763_v51 = vpop.permute.xlu0 %762 }
 0xa69   :  { %v765_v53 = vmul.f32 %v763_v51, %v760_v50 }
 0xa6b   :  { %v767_v54 = vadd.f32 %v766_v52, %v765_v53 }
 0xa6d   :  { %769 = vrot.lane.b32.xlu1 %v767_v54, %s1950_s3 }
 0xabd   :  { %v1205_v45 = vpop.f32.mrb[12].mxu0 }
 0xabe   :  { %v1761_v46 = vpop.f32.mrb[13].mxu0  ;;  %v1206_v49 = vadd.f32 %v2057_v23, %v1205_v45 }
 0xadf   :  { %v770_v57 = vpop.permute.xlu1 %769 }
 0xae0   :  { %1518 = vst.msk [vmem:[%s2248_s5 + $0x18] sm:$0xff] %vm24_vm0, %v770_v57  ;;  %1727 = vmatmul.mubr.msk.f32.vlgmr.msra.gmra.mrb[8].mxu1 %vm24_vm0, %v770_v57 }
 0xae1   :  { %1863 = vmatpush3.bf16.msra.mxu1 %v2009_v9  ;;  %1748 = vmatprep.mubr.msk.f32.mxu1 %vm1947_vm1, %v1946_v4 }
 0xae2   :  { %1864 = vmatprep.subr.bf16.mxu1 %v1945_v0 }
 0xae5   :  { %1866 = vmatpush3.bf16.msra.mxu1 %v2025_v14 }
 0xae6   :  { %1873 = vmatprep.subr.bf16.mxu1 %v1945_v0 }
 0xbb3   :  { %v917_v58 = vpop.f32.mrb[8].mxu1 }
 0xbb4   :  { %v921_v59 = vadd.f32 %v917_v58, %v2050_v17  ;;  %v1728_v60 = vpop.f32.mrb[9].mxu1  ;;  %v922_v62 = vadd.f32 %v917_v58, %v846_v61 }
 0xbb6   :  { %930 = vrot.lane.b32.xlu0 %v921_v59, %s1948_s10  ;;  %v1522_v63 = vmul.f32 -1.442695, %v922_v62  ;;  %v1385_v62 = vpop.f32.mrb[14].mxu0 }
 0xbb8   :  { %1921 = vpow2.f32 %v1522_v63  ;;  %v1783_v63 = vpop.f32.mrb[15].mxu0 }
 0xbc2   :  { %v1922_v1 = vpop.eup %1921 }
 0xbc3   :  { %v926_v2 = vadd.f32 1.0, %v1922_v1 }
 0xbc5   :  { %1923 = vrcp.f32 %v926_v2 }
 0xbcf   :  { %v1924_v3 = vpop.eup %1923 }
 0xbd0   :  { %v940_v15 = vsub.f32 1.0, %v1924_v3  ;;  %v946_v18 = vmul.f32 %v1924_v3, %v767_v54 }
 0xc28   :  { %v931_v6 = vpop.permute.xlu0 %930 }
 0xc29   :  { %v933_v7 = vmul.f32 %v1924_v3, %v931_v6 }
 0xc2b   :  { %935 = vrot.lane.b32.xlu1 %v933_v7, %s1948_s10  ;;  %v1386_v7 = vadd.f32 %v2057_v23, %v1385_v62 }
 0xc9d   :  { %v936_v8 = vpop.permute.xlu1 %935 }
 0xc9e   :  { %v938_v10 = vadd.f32 %v936_v8, %v846_v61 }
 0xca0   :  { %1925 = vtanh.f32 %v938_v10 }
 0xcaa   :  { %v1926_v13 = vpop.eup %1925 }
 0xcab   :  { %942 = vrot.lane.b32.xlu0 %v1926_v13, %s1950_s3 }
 0xd1d   :  { %v943_v16 = vpop.permute.xlu0 %942 }
 0xd1e   :  { %v945_v19 = vmul.f32 %v943_v16, %v940_v15 }
 0xd20   :  { %v947_v20 = vadd.f32 %v946_v18, %v945_v19 }
 0xd22   :  { %949 = vrot.lane.b32.xlu1 %v947_v20, %s1950_s3 }
 0xd94   :  { %v950_v24 = vpop.permute.xlu1 %949 }
 0xd95   :  { %1523 = vst.msk [vmem:[%s2248_s5 + $0x20] sm:$0xff] %vm24_vm0, %v950_v24  ;;  %1749 = vmatmul.mubr.msk.f32.vlgmr.msra.gmra.mrb[10].mxu1 %vm24_vm0, %v950_v24 }
 0xd96   :  { %1875 = vmatpush3.bf16.msra.mxu1 %v2009_v9  ;;  %1770 = vmatprep.mubr.msk.f32.mxu1 %vm1947_vm1, %v1946_v4 }
 0xd97   :  { %1876 = vmatprep.subr.bf16.mxu1 %v1945_v0 }
 0xd9a   :  { %1878 = vmatpush3.bf16.msra.mxu1 %v2025_v14 }
 0xd9b   :  { %1885 = vmatprep.subr.bf16.mxu1 %v1945_v0 }
 0xe68   :  { %v1097_v25 = vpop.f32.mrb[10].mxu1 }
 0xe69   :  { %v1101_v26 = vadd.f32 %v1097_v25, %v2050_v17  ;;  %v1750_v27 = vpop.f32.mrb[11].mxu1  ;;  %v1102_v29 = vadd.f32 %v1097_v25, %v1026_v28 }
 0xe6b   :  { %1110 = vrot.lane.b32.xlu0 %v1101_v26, %s1948_s10  ;;  %v1527_v30 = vmul.f32 -1.442695, %v1102_v29 }
 0xe6d   :  { %1927 = vpow2.f32 %v1527_v30 }
 0xe77   :  { %v1928_v31 = vpop.eup %1927 }
 0xe78   :  { %v1106_v32 = vadd.f32 1.0, %v1928_v31 }
 0xe7a   :  { %1929 = vrcp.f32 %v1106_v32 }
 0xe84   :  { %v1930_v33 = vpop.eup %1929 }
 0xe85   :  { %v1120_v40 = vsub.f32 1.0, %v1930_v33  ;;  %v1126_v42 = vmul.f32 %v1930_v33, %v947_v20 }
 0xedd   :  { %v1111_v34 = vpop.permute.xlu0 %1110 }
 0xede   :  { %v1113_v35 = vmul.f32 %v1930_v33, %v1111_v34 }
 0xee0   :  { %1115 = vrot.lane.b32.xlu1 %v1113_v35, %s1948_s10 }
 0xf52   :  { %v1116_v36 = vpop.permute.xlu1 %1115 }
 0xf53   :  { %v1118_v37 = vadd.f32 %v1116_v36, %v1026_v28 }
 0xf55   :  { %1931 = vtanh.f32 %v1118_v37 }
 0xf5f   :  { %v1932_v39 = vpop.eup %1931 }
 0xf60   :  { %1122 = vrot.lane.b32.xlu0 %v1932_v39, %s1950_s3 }
 0xfd2   :  { %v1123_v41 = vpop.permute.xlu0 %1122 }
 0xfd3   :  { %v1125_v43 = vmul.f32 %v1123_v41, %v1120_v40 }
 0xfd5   :  { %v1127_v44 = vadd.f32 %v1126_v42, %v1125_v43 }
 0xfd7   :  { %1129 = vrot.lane.b32.xlu1 %v1127_v44, %s1950_s3 }
0x1049   :  { %v1130_v5 = vpop.permute.xlu1 %1129 }
0x104a   :  { %1528 = vst.msk [vmem:[%s2248_s5 + $0x28] sm:$0xff] %vm24_vm0, %v1130_v5  ;;  %1771 = vmatmul.mubr.msk.f32.vlgmr.msra.gmra.mrb[12].mxu1 %vm24_vm0, %v1130_v5 }
0x104b   :  { %1887 = vmatpush3.bf16.msra.mxu1 %v2009_v9  ;;  %1792 = vmatprep.mubr.msk.f32.mxu1 %vm1947_vm1, %v1946_v4 }
0x104c   :  { %1888 = vmatprep.subr.bf16.mxu1 %v1945_v0 }
0x104f   :  { %1890 = vmatpush3.bf16.msra.mxu1 %v2025_v14 }
0x111d   :  { %v1277_v12 = vpop.f32.mrb[12].mxu1 }
0x111e   :  { %v1281_v47 = vadd.f32 %v1277_v12, %v2050_v17  ;;  %v1772_v48 = vpop.f32.mrb[13].mxu1  ;;  %v1282_v50 = vadd.f32 %v1277_v12, %v1206_v49 }
0x1120   :  { %1290 = vrot.lane.b32.xlu0 %v1281_v47, %s1948_s10  ;;  %v1532_v51 = vmul.f32 -1.442695, %v1282_v50 }
0x1122   :  { %1933 = vpow2.f32 %v1532_v51 }
0x112c   :  { %v1934_v52 = vpop.eup %1933 }
0x112d   :  { %v1286_v9 = vadd.f32 1.0, %v1934_v52 }
0x112f   :  { %1935 = vrcp.f32 %v1286_v9 }
0x1139   :  { %v1936_v53 = vpop.eup %1935 }
0x113a   :  { %v1300_v57 = vsub.f32 1.0, %v1936_v53  ;;  %v1306_v59 = vmul.f32 %v1936_v53, %v1127_v44 }
0x1192   :  { %v1291_v4 = vpop.permute.xlu0 %1290 }
0x1193   :  { %v1293_v54 = vmul.f32 %v1936_v53, %v1291_v4 }
0x1195   :  { %1295 = vrot.lane.b32.xlu1 %v1293_v54, %s1948_s10 }
0x1207   :  { %v1296_v0 = vpop.permute.xlu1 %1295 }
0x1208   :  { %v1298_v14 = vadd.f32 %v1296_v0, %v1206_v49 }
0x120a   :  { %1937 = vtanh.f32 %v1298_v14 }
0x1214   :  { %v1938_v56 = vpop.eup %1937 }
0x1215   :  { %1302 = vrot.lane.b32.xlu0 %v1938_v56, %s1950_s3 }
0x1287   :  { %v1303_v58 = vpop.permute.xlu0 %1302 }
0x1288   :  { %v1305_v60 = vmul.f32 %v1303_v58, %v1300_v57 }
0x128a   :  { %v1307_v61 = vadd.f32 %v1306_v59, %v1305_v60 }
0x128c   :  { %1309 = vrot.lane.b32.xlu1 %v1307_v61, %s1950_s3 }
0x12fe   :  { %v1310_v1 = vpop.permute.xlu1 %1309 }
0x12ff   :  { %1533 = vst.msk [vmem:[%s2248_s5 + $0x30] sm:$0xff] %vm24_vm0, %v1310_v1  ;;  %1793 = vmatmul.mubr.msk.f32.vlgmr.msra.gmra.mrb[14].mxu1 %vm24_vm0, %v1310_v1 }
0x13d2   :  { %v1457_v2 = vpop.f32.mrb[14].mxu1 }
0x13d3   :  { %v1461_v3 = vadd.f32 %v1457_v2, %v2050_v17  ;;  %v1794_v6 = vpop.f32.mrb[15].mxu1  ;;  %v1462_v8 = vadd.f32 %v1457_v2, %v1386_v7 }
0x13d5   :  { %1470 = vrot.lane.b32.xlu0 %v1461_v3, %s1948_s10  ;;  %v1537_v10 = vmul.f32 -1.442695, %v1462_v8 }
0x13d7   :  { %1939 = vpow2.f32 %v1537_v10 }
0x13e1   :  { %v1940_v11 = vpop.eup %1939 }
0x13e2   :  { %v1466_v13 = vadd.f32 1.0, %v1940_v11 }
0x13e4   :  { %1941 = vrcp.f32 %v1466_v13 }
0x13ee   :  { %v1942_v15 = vpop.eup %1941 }
0x13ef   :  { %v1480_v21 = vsub.f32 1.0, %v1942_v15  ;;  %v1486_v23 = vmul.f32 %v1942_v15, %v1307_v61 }
0x1447   :  { %v1471_v16 = vpop.permute.xlu0 %1470 }
0x1448   :  { %v1473_v18 = vmul.f32 %v1942_v15, %v1471_v16 }
0x144a   :  { %1475 = vrot.lane.b32.xlu1 %v1473_v18, %s1948_s10 }
0x14bc   :  { %v1476_v19 = vpop.permute.xlu1 %1475 }
0x14bd   :  { %v1478_v20 = vadd.f32 %v1476_v19, %v1386_v7 }
0x14bf   :  { %1943 = vtanh.f32 %v1478_v20 }
0x14c9   :  { %v1944_v17 = vpop.eup %1943 }
0x14ca   :  { %1482 = vrot.lane.b32.xlu0 %v1944_v17, %s1950_s3 }
0x153c   :  { %v1483_v22 = vpop.permute.xlu0 %1482 }
0x153d   :  { %v1485_v24 = vmul.f32 %v1483_v22, %v1480_v21 }
0x153f   :  { %v1487_v25 = vadd.f32 %v1486_v23, %v1485_v24 }
0x1541   :  { %1489 = vrot.lane.b32.xlu1 %v1487_v25, %s1950_s3 }
0x15b3   :  { %v1490_v26 = vpop.permute.xlu1 %1489 }
0x15b4   :  { %1538 = vst.msk [vmem:[%s2248_s5 + $0x38] sm:$0xff] %vm24_vm0, %v1490_v26  ;;  %1494 = vst.msk [vmem:[#allocation2] sm:$0xff] %vm24_vm0, %v1490_v26 }

</bundles_post_ra>
